<compile_context>
chip_gen: v7x
topology: tpu7x:2x2x1
jax: 0.10.0
libtpu: 0.0.40
codegen_flags: <defaults>
</compile_context>

<pallas_src>
import jax
import jax.numpy as jnp
import numpy as np
from jax.experimental import pallas as pl
from jax.experimental.pallas import tpu as pltpu

BN_EPS = 1e-5        # torch.nn.BatchNorm1d eps
GN_EPS = 1e-5        # torch_geometric GraphNorm eps
GAT_SLOPE = 0.2      # LeakyReLU slope inside GAT attention
ACT_SLOPE = 0.01     # nn.LeakyReLU() default (activate='leakyReLU')
NEG_INF = -1e30


def _leaky(x, slope):
    return jnp.where(x > 0, x, slope * x)


# ------------------------------ fused kernel ------------------------------- #

def _encoder_kernel(x_ref, adj_ref, bn_ref, w0_ref, wr_ref, pv_ref, o_ref):
    """BatchNorm1d -> L x (GATConv(heads=1) -> GraphNorm -> LeakyReLU).

    bn_ref rows: 0 weight, 1 bias, 2 running_mean, 3 running_var.
    pv_ref rows per layer: 0 att_src, 1 att_dst, 2 gat bias, 3 gn weight,
    4 gn bias, 5 gn mean_scale (rows 6,7 are padding).
    Writes a lane-dense slab: o_ref[:, l*E:(l+1)*E] = layer-l activation.
    """
    n_layers = pv_ref.shape[0]

    mask = adj_ref[...] > 0.0                                   # (N, N), once

    # --- BatchNorm1d (eval mode, running statistics) ---
    bn = bn_ref[...]                                            # (4, F)
    x = x_ref[...]
    x = (x - bn[2:3, :]) * jax.lax.rsqrt(bn[3:4, :] + BN_EPS) * bn[0:1, :] \
        + bn[1:2, :]

    outs = []
    for li in range(n_layers):                                  # static unroll
        w = w0_ref[...] if li == 0 else wr_ref[li - 1]          # (Fin, E)
        pv = pv_ref[li]                                         # (8, E)
        a_src, a_dst = pv[0:1, :], pv[1:2, :]
        bias = pv[2:3, :]
        gn_w, gn_b, gn_m = pv[3:4, :], pv[4:5, :], pv[5:6, :]

        # linear projection on the MXU: bf16 inputs, f32 accumulation
        h = jnp.dot(x.astype(jnp.bfloat16), w.astype(jnp.bfloat16),
                    preferred_element_type=jnp.float32)         # (N, E)

        # attention logits e[i, j] = leaky(a_dst.h_i + a_src.h_j):
        # VPU reductions + a tiny (N,1)->(1,N) transpose (no h.T transpose,
        # no degenerate M=1 matmul).
        al_src = jnp.sum(h * a_src, axis=-1, keepdims=True)     # (N, 1)
        al_dst = jnp.sum(h * a_dst, axis=-1, keepdims=True)     # (N, 1)
        s = _leaky(al_dst + al_src.T, GAT_SLOPE)                # (N, N)
        s = jnp.where(mask, s, NEG_INF)

        # softmax over incoming edges of each destination node (row-wise);
        # the normalization is applied after the matmul (flash-attn style).
        m = jnp.max(s, axis=-1, keepdims=True)
        p = jnp.where(mask, jnp.exp(s - m), 0.0)
        den = jnp.sum(p, axis=-1, keepdims=True)
        has_edge = den > 0.0
        den_safe = jnp.where(has_edge, den, 1.0)

        out = jnp.dot(p.astype(jnp.bfloat16), h.astype(jnp.bfloat16),
                      preferred_element_type=jnp.float32)       # (N, E)
        # NOTE: pl.reciprocal(den_safe, approx=True) would move this divide to
        # the EUP slot; an exact f32 divide is kept so the bf16 self-check in
        # __main__ stays bit-stable across layers.
        out = out / den_safe
        out = jnp.where(has_edge, out, 0.0) + bias

        # GraphNorm over all nodes (batch=None -> single graph), f32 stats
        mean = jnp.mean(out, axis=0, keepdims=True)
        cen = out - mean * gn_m
        var = jnp.mean(cen * cen, axis=0, keepdims=True)
        y = gn_w * cen * jax.lax.rsqrt(var + GN_EPS) + gn_b

        # activation; dropout(p=0.3) is identity in inference mode
        x = _leaky(y, ACT_SLOPE)
        outs.append(x)

    # single unmasked, 128-lane-wide store of the whole (N, L*E) slab
    o_ref[...] = jnp.concatenate(outs, axis=-1)


# ------------------------------ call wrapper -------------------------------- #

def graph_encoder_norm_forward(x, adj, params):
    """Graph_Encoder_Norm.forward(x, edge_index) with default flags
    (acummulate=False, return_one=False, remove_random=False) -> (x, x, xs)."""
    n, f = x.shape
    layers = params["layers"]
    n_layers = len(layers)
    emb = layers[0][0].shape[1]

    bn_w, bn_b, bn_rm, bn_rv = params["bn"]
    bn_pack = jnp.concatenate([bn_w, bn_b, bn_rm, bn_rv], axis=0)       # (4, F)

    w0 = layers[0][0]                                                   # (F, E)
    w_rest = jnp.stack([lay[0] for lay in layers[1:]], axis=0)          # (L-1,E,E)
    pv = jnp.stack(
        [jnp.concatenate(list(lay[1:]) + [jnp.zeros((2, emb), jnp.float32)],
                         axis=0)
         for lay in layers], axis=0)                                    # (L, 8, E)

    # NOTE: single-block design (everything fits VMEM at these sizes).  For
    # large N, row-tile the grid over destinations with a parallel axis and an
    # online softmax over source tiles so adj/s/p are never full NxN and the
    # second v7x TensorCore is used.
    slab = pl.pallas_call(
        _encoder_kernel,
        grid=(1,),
        in_specs=[
            pl.BlockSpec((n, f), lambda i: (0, 0)),
            pl.BlockSpec((n, n), lambda i: (0, 0)),
            pl.BlockSpec((4, f), lambda i: (0, 0)),
            pl.BlockSpec((f, emb), lambda i: (0, 0)),
            pl.BlockSpec((n_layers - 1, emb, emb), lambda i: (0, 0, 0)),
            pl.BlockSpec((n_layers, 8, emb), lambda i: (0, 0, 0)),
        ],
        out_specs=pl.BlockSpec((n, n_layers * emb), lambda i: (0, 0)),
        out_shape=jax.ShapeDtypeStruct((n, n_layers * emb), jnp.float32),
        compiler_params=pltpu.CompilerParams(
            dimension_semantics=("arbitrary",)),
    )(x, adj, bn_pack, w0, w_rest, pv)

    x_out = slab[:, (n_layers - 1) * emb:]
    # xs[:, l] = layer-l activation flattened to (N*E,).  F.pad in the torch
    # code is a no-op because every layer produces N*E elements.
    xs = jnp.transpose(slab.reshape(n, n_layers, emb), (0, 2, 1))
    xs = xs.reshape(n * emb, n_layers)
    return x_out, x_out, xs


# ------------------------- pure-JAX reference check ------------------------- #

def _ref_forward(x, adj, params):
    bw, bb, brm, brv = params["bn"]
    x = (x - brm) * jax.lax.rsqrt(brv + BN_EPS) * bw + bb
    mask = adj > 0
    xs = []
    for (w, a_s, a_d, b, gw, gb, gm) in params["layers"]:
        h = jnp.dot(x.astype(jnp.bfloat16), w.astype(jnp.bfloat16),
                    preferred_element_type=jnp.float32)
        al_s = jnp.sum(h * a_s, axis=-1, keepdims=True)
        al_d = jnp.sum(h * a_d, axis=-1, keepdims=True)
        s = _leaky(al_d + al_s.T, GAT_SLOPE)
        s = jnp.where(mask, s, NEG_INF)
        m = jnp.max(s, axis=-1, keepdims=True)
        p = jnp.where(mask, jnp.exp(s - m), 0.0)
        den = jnp.sum(p, axis=-1, keepdims=True)
        has = den > 0
        den_safe = jnp.where(has, den, 1.0)
        out = jnp.dot(p.astype(jnp.bfloat16), h.astype(jnp.bfloat16),
                      preferred_element_type=jnp.float32) / den_safe
        out = jnp.where(has, out, 0.0) + b
        mean = jnp.mean(out, axis=0, keepdims=True)
        cen = out - mean * gm
        var = jnp.mean(cen * cen, axis=0, keepdims=True)
        y = gw * cen * jax.lax.rsqrt(var + GN_EPS) + gb
        x = _leaky(y, ACT_SLOPE)
        xs.append(x.reshape(-1))
    return x, x, jnp.stack(xs, axis=1)


if __name__ == "__main__":
    N, F, E, L = 16, 8, 32, 4   # nodes, num_features, embedding_size, num_layers

    key = jax.random.PRNGKey(0)
    keys = iter(jax.random.split(key, 64))

    def nrm(shape, scale=0.2):
        return jax.random.normal(next(keys), shape, jnp.float32) * scale

    x = nrm((N, F), 1.0)

    # graph: ring edges i -> i+1 plus skip edges i -> i+3 (edge j->i sets adj[i, j])
    src = np.arange(N)
    adj_np = np.zeros((N, N), np.float32)
    adj_np[(src + 1) % N, src] = 1.0
    adj_np[(src + 3) % N, src] = 1.0
    adj = jnp.asarray(adj_np)

    bn_params = (nrm((1, F)) + 1.0,              # weight
                 nrm((1, F)),                    # bias
                 nrm((1, F)),                    # running_mean
                 jnp.abs(nrm((1, F))) + 0.5)     # running_var

    layers = []
    for li in range(L):
        fin = F if li == 0 else E
        layers.append((nrm((fin, E)),            # GAT linear weight (in, E)
                       nrm((1, E)),              # att_src
                       nrm((1, E)),              # att_dst
                       nrm((1, E)),              # GAT bias
                       nrm((1, E)) + 1.0,        # GraphNorm weight
                       nrm((1, E)),              # GraphNorm bias
                       nrm((1, E)) + 1.0))       # GraphNorm mean_scale
    params = {"bn": bn_params, "layers": layers}

    out_x, out_x2, out_xs = graph_encoder_norm_forward(x, adj, params)
    jax.block_until_ready((out_x, out_x2, out_xs))

    ref_x, _, ref_xs = _ref_forward(x, adj, params)
    # bf16 MXU inputs (with f32 accumulation) in both kernel and reference ->
    # bf16-level tolerance.
    np.testing.assert_allclose(np.asarray(out_x), np.asarray(ref_x),
                               rtol=1e-2, atol=1e-2)
    np.testing.assert_allclose(np.asarray(out_xs), np.asarray(ref_xs),
                               rtol=1e-2, atol=1e-2)
    assert out_x.shape == (N, E) and out_xs.shape == (N * E, L)

    print("KERNEL_OK")
</pallas_src>

<mosaic_0001>
module attributes {stable_mosaic.version = 11 : i64} {
  func.func @_encoder_kernel(%arg0: i32, %arg1: memref<16x8xf32, #tpu.memory_space<vmem>>, %arg2: memref<16x16xf32, #tpu.memory_space<vmem>>, %arg3: memref<4x8xf32, #tpu.memory_space<vmem>>, %arg4: memref<8x32xf32, #tpu.memory_space<vmem>>, %arg5: memref<3x32x32xf32, #tpu.memory_space<vmem>>, %arg6: memref<4x8x32xf32, #tpu.memory_space<vmem>>, %arg7: memref<16x128xf32, #tpu.memory_space<vmem>>) attributes {dimension_semantics = [#tpu.dimension_semantics<arbitrary>], iteration_bounds = array<i64: 1>, scalar_prefetch = 0 : i64, scratch_operands = 0 : i64, tpu.core_type = #tpu.core_type<tc>, window_params = [{pipeline_mode = #tpu.pipeline_mode<synchronous>, transform_indices = @transform_0, window_bounds = array<i64: 16, 8>}, {pipeline_mode = #tpu.pipeline_mode<synchronous>, transform_indices = @transform_1, window_bounds = array<i64: 16, 16>}, {pipeline_mode = #tpu.pipeline_mode<synchronous>, transform_indices = @transform_2, window_bounds = array<i64: 4, 8>}, {pipeline_mode = #tpu.pipeline_mode<synchronous>, transform_indices = @transform_3, window_bounds = array<i64: 8, 32>}, {pipeline_mode = #tpu.pipeline_mode<synchronous>, transform_indices = @transform_4, window_bounds = array<i64: 3, 32, 32>}, {pipeline_mode = #tpu.pipeline_mode<synchronous>, transform_indices = @transform_5, window_bounds = array<i64: 4, 8, 32>}, {pipeline_mode = #tpu.pipeline_mode<synchronous>, transform_indices = @transform_6, window_bounds = array<i64: 16, 128>}]} {
    %c0 = arith.constant 0 : index
    %c0_0 = arith.constant 0 : index
    %0 = vector.load %arg2[%c0, %c0_0] : memref<16x16xf32, #tpu.memory_space<vmem>>, vector<16x16xf32>
    %cst = arith.constant 0.000000e+00 : f32
    %1 = vector.broadcast %cst : f32 to vector<16x16xf32>
    %2 = arith.cmpf ogt, %0, %1 : vector<16x16xf32>
    %c0_1 = arith.constant 0 : index
    %c0_2 = arith.constant 0 : index
    %3 = vector.load %arg3[%c0_1, %c0_2] : memref<4x8xf32, #tpu.memory_space<vmem>>, vector<4x8xf32>
    %c0_3 = arith.constant 0 : index
    %c0_4 = arith.constant 0 : index
    %4 = vector.load %arg1[%c0_3, %c0_4] : memref<16x8xf32, #tpu.memory_space<vmem>>, vector<16x8xf32>
    %5 = vector.extract_strided_slice %3 {offsets = [2, 0], sizes = [1, 8], strides = [1, 1]} : vector<4x8xf32> to vector<1x8xf32>
    %6 = vector.broadcast %5 : vector<1x8xf32> to vector<16x8xf32>
    %7 = arith.subf %4, %6 : vector<16x8xf32>
    %8 = vector.extract_strided_slice %3 {offsets = [3, 0], sizes = [1, 8], strides = [1, 1]} : vector<4x8xf32> to vector<1x8xf32>
    %cst_5 = arith.constant 9.99999974E-6 : f32
    %9 = vector.broadcast %cst_5 : f32 to vector<1x8xf32>
    %10 = arith.addf %8, %9 : vector<1x8xf32>
    %11 = math.rsqrt %10 : vector<1x8xf32>
    %12 = vector.broadcast %11 : vector<1x8xf32> to vector<16x8xf32>
    %13 = arith.mulf %7, %12 : vector<16x8xf32>
    %14 = vector.extract_strided_slice %3 {offsets = [0, 0], sizes = [1, 8], strides = [1, 1]} : vector<4x8xf32> to vector<1x8xf32>
    %15 = vector.broadcast %14 : vector<1x8xf32> to vector<16x8xf32>
    %16 = arith.mulf %13, %15 : vector<16x8xf32>
    %17 = vector.extract_strided_slice %3 {offsets = [1, 0], sizes = [1, 8], strides = [1, 1]} : vector<4x8xf32> to vector<1x8xf32>
    %18 = vector.broadcast %17 : vector<1x8xf32> to vector<16x8xf32>
    %19 = arith.addf %16, %18 : vector<16x8xf32>
    %c0_6 = arith.constant 0 : index
    %c0_7 = arith.constant 0 : index
    %20 = vector.load %arg4[%c0_6, %c0_7] : memref<8x32xf32, #tpu.memory_space<vmem>>, vector<8x32xf32>
    %c0_8 = arith.constant 0 : index
    %c0_9 = arith.constant 0 : index
    %c0_10 = arith.constant 0 : index
    %21 = vector.load %arg6[%c0_8, %c0_9, %c0_10] : memref<4x8x32xf32, #tpu.memory_space<vmem>>, vector<1x8x32xf32>
    %22 = vector.shape_cast %21 : vector<1x8x32xf32> to vector<8x32xf32>
    %23 = vector.extract_strided_slice %22 {offsets = [0, 0], sizes = [1, 32], strides = [1, 1]} : vector<8x32xf32> to vector<1x32xf32>
    %24 = vector.extract_strided_slice %22 {offsets = [1, 0], sizes = [1, 32], strides = [1, 1]} : vector<8x32xf32> to vector<1x32xf32>
    %25 = vector.extract_strided_slice %22 {offsets = [2, 0], sizes = [1, 32], strides = [1, 1]} : vector<8x32xf32> to vector<1x32xf32>
    %26 = vector.extract_strided_slice %22 {offsets = [3, 0], sizes = [1, 32], strides = [1, 1]} : vector<8x32xf32> to vector<1x32xf32>
    %27 = vector.extract_strided_slice %22 {offsets = [4, 0], sizes = [1, 32], strides = [1, 1]} : vector<8x32xf32> to vector<1x32xf32>
    %28 = vector.extract_strided_slice %22 {offsets = [5, 0], sizes = [1, 32], strides = [1, 1]} : vector<8x32xf32> to vector<1x32xf32>
    %29 = arith.truncf %19 : vector<16x8xf32> to vector<16x8xbf16>
    %30 = arith.truncf %20 : vector<8x32xf32> to vector<8x32xbf16>
    %cst_11 = arith.constant dense<0.000000e+00> : vector<16x32xf32>
    %31 = tpu.matmul %29, %30, %cst_11 {dimension_numbers = #tpu.dot_dimension_numbers<[1], [0], [0], [1], [0, 0, 1, 1], [], []>} : vector<16x8xbf16>, vector<8x32xbf16>, vector<16x32xf32> -> vector<16x32xf32>
    %32 = vector.broadcast %23 : vector<1x32xf32> to vector<16x32xf32>
    %33 = arith.mulf %31, %32 : vector<16x32xf32>
    %cst_12 = arith.constant dense<0.000000e+00> : vector<16xf32>
    %34 = vector.multi_reduction <add>, %33, %cst_12 [1] : vector<16x32xf32> to vector<16xf32>
    %35 = vector.shape_cast %34 : vector<16xf32> to vector<16x1xf32>
    %36 = vector.broadcast %24 : vector<1x32xf32> to vector<16x32xf32>
    %37 = arith.mulf %31, %36 : vector<16x32xf32>
    %cst_13 = arith.constant dense<0.000000e+00> : vector<16xf32>
    %38 = vector.multi_reduction <add>, %37, %cst_13 [1] : vector<16x32xf32> to vector<16xf32>
    %39 = vector.shape_cast %38 : vector<16xf32> to vector<16x1xf32>
    %40 = tpu.transpose %35, [1, 0] : vector<16x1xf32> -> vector<1x16xf32>
    %41 = vector.broadcast %39 : vector<16x1xf32> to vector<16x16xf32>
    %42 = vector.broadcast %40 : vector<1x16xf32> to vector<16x16xf32>
    %43 = arith.addf %41, %42 : vector<16x16xf32>
    %cst_14 = arith.constant 0.000000e+00 : f32
    %44 = vector.broadcast %cst_14 : f32 to vector<16x16xf32>
    %45 = arith.cmpf ogt, %43, %44 : vector<16x16xf32>
    %cst_15 = arith.constant 2.000000e-01 : f32
    %46 = vector.broadcast %cst_15 : f32 to vector<16x16xf32>
    %47 = arith.mulf %46, %43 : vector<16x16xf32>
    %48 = arith.select %45, %43, %47 : vector<16x16xi1>, vector<16x16xf32>
    %cst_16 = arith.constant -1.000000e+30 : f32
    %49 = vector.broadcast %cst_16 : f32 to vector<16x16xf32>
    %50 = arith.select %2, %48, %49 : vector<16x16xi1>, vector<16x16xf32>
    %cst_17 = arith.constant dense<0xFF800000> : vector<16xf32>
    %51 = vector.multi_reduction <maximumf>, %50, %cst_17 [1] : vector<16x16xf32> to vector<16xf32>
    %52 = vector.shape_cast %51 : vector<16xf32> to vector<16x1xf32>
    %53 = vector.broadcast %52 : vector<16x1xf32> to vector<16x16xf32>
    %54 = arith.subf %50, %53 : vector<16x16xf32>
    %55 = math.exp %54 : vector<16x16xf32>
    %cst_18 = arith.constant 0.000000e+00 : f32
    %56 = vector.broadcast %cst_18 : f32 to vector<16x16xf32>
    %57 = arith.select %2, %55, %56 : vector<16x16xi1>, vector<16x16xf32>
    %cst_19 = arith.constant dense<0.000000e+00> : vector<16xf32>
    %58 = vector.multi_reduction <add>, %57, %cst_19 [1] : vector<16x16xf32> to vector<16xf32>
    %59 = vector.shape_cast %58 : vector<16xf32> to vector<16x1xf32>
    %cst_20 = arith.constant 0.000000e+00 : f32
    %60 = vector.broadcast %cst_20 : f32 to vector<16x1xf32>
    %61 = arith.cmpf ogt, %59, %60 : vector<16x1xf32>
    %cst_21 = arith.constant 1.000000e+00 : f32
    %62 = vector.broadcast %cst_21 : f32 to vector<16x1xf32>
    %63 = arith.select %61, %59, %62 : vector<16x1xi1>, vector<16x1xf32>
    %64 = arith.truncf %57 : vector<16x16xf32> to vector<16x16xbf16>
    %65 = arith.truncf %31 : vector<16x32xf32> to vector<16x32xbf16>
    %cst_22 = arith.constant dense<0.000000e+00> : vector<16x32xf32>
    %66 = tpu.matmul %64, %65, %cst_22 {dimension_numbers = #tpu.dot_dimension_numbers<[1], [0], [0], [1], [0, 0, 1, 1], [], []>} : vector<16x16xbf16>, vector<16x32xbf16>, vector<16x32xf32> -> vector<16x32xf32>
    %67 = vector.broadcast %63 : vector<16x1xf32> to vector<16x32xf32>
    %68 = arith.divf %66, %67 : vector<16x32xf32>
    %cst_23 = arith.constant 0.000000e+00 : f32
    %69 = vector.shape_cast %61 : vector<16x1xi1> to vector<16x1xi1>
    %70 = vector.broadcast %69 : vector<16x1xi1> to vector<16x32xi1>
    %71 = vector.broadcast %cst_23 : f32 to vector<16x32xf32>
    %72 = arith.select %70, %68, %71 : vector<16x32xi1>, vector<16x32xf32>
    %73 = vector.broadcast %25 : vector<1x32xf32> to vector<16x32xf32>
    %74 = arith.addf %72, %73 : vector<16x32xf32>
    %cst_24 = arith.constant dense<0.000000e+00> : vector<32xf32>
    %75 = vector.multi_reduction <add>, %74, %cst_24 [0] : vector<16x32xf32> to vector<32xf32>
    %76 = vector.shape_cast %75 : vector<32xf32> to vector<1x32xf32>
    %cst_25 = arith.constant 1.600000e+01 : f32
    %77 = vector.broadcast %cst_25 : f32 to vector<1x32xf32>
    %78 = arith.divf %76, %77 : vector<1x32xf32>
    %79 = arith.mulf %78, %28 : vector<1x32xf32>
    %80 = vector.broadcast %79 : vector<1x32xf32> to vector<16x32xf32>
    %81 = arith.subf %74, %80 : vector<16x32xf32>
    %82 = arith.mulf %81, %81 : vector<16x32xf32>
    %cst_26 = arith.constant dense<0.000000e+00> : vector<32xf32>
    %83 = vector.multi_reduction <add>, %82, %cst_26 [0] : vector<16x32xf32> to vector<32xf32>
    %84 = vector.shape_cast %83 : vector<32xf32> to vector<1x32xf32>
    %cst_27 = arith.constant 1.600000e+01 : f32
    %85 = vector.broadcast %cst_27 : f32 to vector<1x32xf32>
    %86 = arith.divf %84, %85 : vector<1x32xf32>
    %87 = vector.broadcast %26 : vector<1x32xf32> to vector<16x32xf32>
    %88 = arith.mulf %87, %81 : vector<16x32xf32>
    %cst_28 = arith.constant 9.99999974E-6 : f32
    %89 = vector.broadcast %cst_28 : f32 to vector<1x32xf32>
    %90 = arith.addf %86, %89 : vector<1x32xf32>
    %91 = math.rsqrt %90 : vector<1x32xf32>
    %92 = vector.broadcast %91 : vector<1x32xf32> to vector<16x32xf32>
    %93 = arith.mulf %88, %92 : vector<16x32xf32>
    %94 = vector.broadcast %27 : vector<1x32xf32> to vector<16x32xf32>
    %95 = arith.addf %93, %94 : vector<16x32xf32>
    %cst_29 = arith.constant 0.000000e+00 : f32
    %96 = vector.broadcast %cst_29 : f32 to vector<16x32xf32>
    %97 = arith.cmpf ogt, %95, %96 : vector<16x32xf32>
    %cst_30 = arith.constant 0.00999999977 : f32
    %98 = vector.broadcast %cst_30 : f32 to vector<16x32xf32>
    %99 = arith.mulf %98, %95 : vector<16x32xf32>
    %100 = arith.select %97, %95, %99 : vector<16x32xi1>, vector<16x32xf32>
    %c0_31 = arith.constant 0 : index
    %c0_32 = arith.constant 0 : index
    %c0_33 = arith.constant 0 : index
    %101 = vector.load %arg5[%c0_31, %c0_32, %c0_33] : memref<3x32x32xf32, #tpu.memory_space<vmem>>, vector<1x32x32xf32>
    %102 = vector.shape_cast %101 : vector<1x32x32xf32> to vector<32x32xf32>
    %c1 = arith.constant 1 : index
    %c0_34 = arith.constant 0 : index
    %c0_35 = arith.constant 0 : index
    %103 = vector.load %arg6[%c1, %c0_34, %c0_35] : memref<4x8x32xf32, #tpu.memory_space<vmem>>, vector<1x8x32xf32>
    %104 = vector.shape_cast %103 : vector<1x8x32xf32> to vector<8x32xf32>
    %105 = vector.extract_strided_slice %104 {offsets = [0, 0], sizes = [1, 32], strides = [1, 1]} : vector<8x32xf32> to vector<1x32xf32>
    %106 = vector.extract_strided_slice %104 {offsets = [1, 0], sizes = [1, 32], strides = [1, 1]} : vector<8x32xf32> to vector<1x32xf32>
    %107 = vector.extract_strided_slice %104 {offsets = [2, 0], sizes = [1, 32], strides = [1, 1]} : vector<8x32xf32> to vector<1x32xf32>
    %108 = vector.extract_strided_slice %104 {offsets = [3, 0], sizes = [1, 32], strides = [1, 1]} : vector<8x32xf32> to vector<1x32xf32>
    %109 = vector.extract_strided_slice %104 {offsets = [4, 0], sizes = [1, 32], strides = [1, 1]} : vector<8x32xf32> to vector<1x32xf32>
    %110 = vector.extract_strided_slice %104 {offsets = [5, 0], sizes = [1, 32], strides = [1, 1]} : vector<8x32xf32> to vector<1x32xf32>
    %111 = arith.truncf %100 : vector<16x32xf32> to vector<16x32xbf16>
    %112 = arith.truncf %102 : vector<32x32xf32> to vector<32x32xbf16>
    %cst_36 = arith.constant dense<0.000000e+00> : vector<16x32xf32>
    %113 = tpu.matmul %111, %112, %cst_36 {dimension_numbers = #tpu.dot_dimension_numbers<[1], [0], [0], [1], [0, 0, 1, 1], [], []>} : vector<16x32xbf16>, vector<32x32xbf16>, vector<16x32xf32> -> vector<16x32xf32>
    %114 = vector.broadcast %105 : vector<1x32xf32> to vector<16x32xf32>
    %115 = arith.mulf %113, %114 : vector<16x32xf32>
    %cst_37 = arith.constant dense<0.000000e+00> : vector<16xf32>
    %116 = vector.multi_reduction <add>, %115, %cst_37 [1] : vector<16x32xf32> to vector<16xf32>
    %117 = vector.shape_cast %116 : vector<16xf32> to vector<16x1xf32>
    %118 = vector.broadcast %106 : vector<1x32xf32> to vector<16x32xf32>
    %119 = arith.mulf %113, %118 : vector<16x32xf32>
    %cst_38 = arith.constant dense<0.000000e+00> : vector<16xf32>
    %120 = vector.multi_reduction <add>, %119, %cst_38 [1] : vector<16x32xf32> to vector<16xf32>
    %121 = vector.shape_cast %120 : vector<16xf32> to vector<16x1xf32>
    %122 = tpu.transpose %117, [1, 0] : vector<16x1xf32> -> vector<1x16xf32>
    %123 = vector.broadcast %121 : vector<16x1xf32> to vector<16x16xf32>
    %124 = vector.broadcast %122 : vector<1x16xf32> to vector<16x16xf32>
    %125 = arith.addf %123, %124 : vector<16x16xf32>
    %cst_39 = arith.constant 0.000000e+00 : f32
    %126 = vector.broadcast %cst_39 : f32 to vector<16x16xf32>
    %127 = arith.cmpf ogt, %125, %126 : vector<16x16xf32>
    %cst_40 = arith.constant 2.000000e-01 : f32
    %128 = vector.broadcast %cst_40 : f32 to vector<16x16xf32>
    %129 = arith.mulf %128, %125 : vector<16x16xf32>
    %130 = arith.select %127, %125, %129 : vector<16x16xi1>, vector<16x16xf32>
    %cst_41 = arith.constant -1.000000e+30 : f32
    %131 = vector.broadcast %cst_41 : f32 to vector<16x16xf32>
    %132 = arith.select %2, %130, %131 : vector<16x16xi1>, vector<16x16xf32>
    %cst_42 = arith.constant dense<0xFF800000> : vector<16xf32>
    %133 = vector.multi_reduction <maximumf>, %132, %cst_42 [1] : vector<16x16xf32> to vector<16xf32>
    %134 = vector.shape_cast %133 : vector<16xf32> to vector<16x1xf32>
    %135 = vector.broadcast %134 : vector<16x1xf32> to vector<16x16xf32>
    %136 = arith.subf %132, %135 : vector<16x16xf32>
    %137 = math.exp %136 : vector<16x16xf32>
    %cst_43 = arith.constant 0.000000e+00 : f32
    %138 = vector.broadcast %cst_43 : f32 to vector<16x16xf32>
    %139 = arith.select %2, %137, %138 : vector<16x16xi1>, vector<16x16xf32>
    %cst_44 = arith.constant dense<0.000000e+00> : vector<16xf32>
    %140 = vector.multi_reduction <add>, %139, %cst_44 [1] : vector<16x16xf32> to vector<16xf32>
    %141 = vector.shape_cast %140 : vector<16xf32> to vector<16x1xf32>
    %cst_45 = arith.constant 0.000000e+00 : f32
    %142 = vector.broadcast %cst_45 : f32 to vector<16x1xf32>
    %143 = arith.cmpf ogt, %141, %142 : vector<16x1xf32>
    %cst_46 = arith.constant 1.000000e+00 : f32
    %144 = vector.broadcast %cst_46 : f32 to vector<16x1xf32>
    %145 = arith.select %143, %141, %144 : vector<16x1xi1>, vector<16x1xf32>
    %146 = arith.truncf %139 : vector<16x16xf32> to vector<16x16xbf16>
    %147 = arith.truncf %113 : vector<16x32xf32> to vector<16x32xbf16>
    %cst_47 = arith.constant dense<0.000000e+00> : vector<16x32xf32>
    %148 = tpu.matmul %146, %147, %cst_47 {dimension_numbers = #tpu.dot_dimension_numbers<[1], [0], [0], [1], [0, 0, 1, 1], [], []>} : vector<16x16xbf16>, vector<16x32xbf16>, vector<16x32xf32> -> vector<16x32xf32>
    %149 = vector.broadcast %145 : vector<16x1xf32> to vector<16x32xf32>
    %150 = arith.divf %148, %149 : vector<16x32xf32>
    %cst_48 = arith.constant 0.000000e+00 : f32
    %151 = vector.shape_cast %143 : vector<16x1xi1> to vector<16x1xi1>
    %152 = vector.broadcast %151 : vector<16x1xi1> to vector<16x32xi1>
    %153 = vector.broadcast %cst_48 : f32 to vector<16x32xf32>
    %154 = arith.select %152, %150, %153 : vector<16x32xi1>, vector<16x32xf32>
    %155 = vector.broadcast %107 : vector<1x32xf32> to vector<16x32xf32>
    %156 = arith.addf %154, %155 : vector<16x32xf32>
    %cst_49 = arith.constant dense<0.000000e+00> : vector<32xf32>
    %157 = vector.multi_reduction <add>, %156, %cst_49 [0] : vector<16x32xf32> to vector<32xf32>
    %158 = vector.shape_cast %157 : vector<32xf32> to vector<1x32xf32>
    %cst_50 = arith.constant 1.600000e+01 : f32
    %159 = vector.broadcast %cst_50 : f32 to vector<1x32xf32>
    %160 = arith.divf %158, %159 : vector<1x32xf32>
    %161 = arith.mulf %160, %110 : vector<1x32xf32>
    %162 = vector.broadcast %161 : vector<1x32xf32> to vector<16x32xf32>
    %163 = arith.subf %156, %162 : vector<16x32xf32>
    %164 = arith.mulf %163, %163 : vector<16x32xf32>
    %cst_51 = arith.constant dense<0.000000e+00> : vector<32xf32>
    %165 = vector.multi_reduction <add>, %164, %cst_51 [0] : vector<16x32xf32> to vector<32xf32>
    %166 = vector.shape_cast %165 : vector<32xf32> to vector<1x32xf32>
    %cst_52 = arith.constant 1.600000e+01 : f32
    %167 = vector.broadcast %cst_52 : f32 to vector<1x32xf32>
    %168 = arith.divf %166, %167 : vector<1x32xf32>
    %169 = vector.broadcast %108 : vector<1x32xf32> to vector<16x32xf32>
    %170 = arith.mulf %169, %163 : vector<16x32xf32>
    %cst_53 = arith.constant 9.99999974E-6 : f32
    %171 = vector.broadcast %cst_53 : f32 to vector<1x32xf32>
    %172 = arith.addf %168, %171 : vector<1x32xf32>
    %173 = math.rsqrt %172 : vector<1x32xf32>
    %174 = vector.broadcast %173 : vector<1x32xf32> to vector<16x32xf32>
    %175 = arith.mulf %170, %174 : vector<16x32xf32>
    %176 = vector.broadcast %109 : vector<1x32xf32> to vector<16x32xf32>
    %177 = arith.addf %175, %176 : vector<16x32xf32>
    %cst_54 = arith.constant 0.000000e+00 : f32
    %178 = vector.broadcast %cst_54 : f32 to vector<16x32xf32>
    %179 = arith.cmpf ogt, %177, %178 : vector<16x32xf32>
    %cst_55 = arith.constant 0.00999999977 : f32
    %180 = vector.broadcast %cst_55 : f32 to vector<16x32xf32>
    %181 = arith.mulf %180, %177 : vector<16x32xf32>
    %182 = arith.select %179, %177, %181 : vector<16x32xi1>, vector<16x32xf32>
    %c1_56 = arith.constant 1 : index
    %c0_57 = arith.constant 0 : index
    %c0_58 = arith.constant 0 : index
    %183 = vector.load %arg5[%c1_56, %c0_57, %c0_58] : memref<3x32x32xf32, #tpu.memory_space<vmem>>, vector<1x32x32xf32>
    %184 = vector.shape_cast %183 : vector<1x32x32xf32> to vector<32x32xf32>
    %c2 = arith.constant 2 : index
    %c0_59 = arith.constant 0 : index
    %c0_60 = arith.constant 0 : index
    %185 = vector.load %arg6[%c2, %c0_59, %c0_60] : memref<4x8x32xf32, #tpu.memory_space<vmem>>, vector<1x8x32xf32>
    %186 = vector.shape_cast %185 : vector<1x8x32xf32> to vector<8x32xf32>
    %187 = vector.extract_strided_slice %186 {offsets = [0, 0], sizes = [1, 32], strides = [1, 1]} : vector<8x32xf32> to vector<1x32xf32>
    %188 = vector.extract_strided_slice %186 {offsets = [1, 0], sizes = [1, 32], strides = [1, 1]} : vector<8x32xf32> to vector<1x32xf32>
    %189 = vector.extract_strided_slice %186 {offsets = [2, 0], sizes = [1, 32], strides = [1, 1]} : vector<8x32xf32> to vector<1x32xf32>
    %190 = vector.extract_strided_slice %186 {offsets = [3, 0], sizes = [1, 32], strides = [1, 1]} : vector<8x32xf32> to vector<1x32xf32>
    %191 = vector.extract_strided_slice %186 {offsets = [4, 0], sizes = [1, 32], strides = [1, 1]} : vector<8x32xf32> to vector<1x32xf32>
    %192 = vector.extract_strided_slice %186 {offsets = [5, 0], sizes = [1, 32], strides = [1, 1]} : vector<8x32xf32> to vector<1x32xf32>
    %193 = arith.truncf %182 : vector<16x32xf32> to vector<16x32xbf16>
    %194 = arith.truncf %184 : vector<32x32xf32> to vector<32x32xbf16>
    %cst_61 = arith.constant dense<0.000000e+00> : vector<16x32xf32>
    %195 = tpu.matmul %193, %194, %cst_61 {dimension_numbers = #tpu.dot_dimension_numbers<[1], [0], [0], [1], [0, 0, 1, 1], [], []>} : vector<16x32xbf16>, vector<32x32xbf16>, vector<16x32xf32> -> vector<16x32xf32>
    %196 = vector.broadcast %187 : vector<1x32xf32> to vector<16x32xf32>
    %197 = arith.mulf %195, %196 : vector<16x32xf32>
    %cst_62 = arith.constant dense<0.000000e+00> : vector<16xf32>
    %198 = vector.multi_reduction <add>, %197, %cst_62 [1] : vector<16x32xf32> to vector<16xf32>
    %199 = vector.shape_cast %198 : vector<16xf32> to vector<16x1xf32>
    %200 = vector.broadcast %188 : vector<1x32xf32> to vector<16x32xf32>
    %201 = arith.mulf %195, %200 : vector<16x32xf32>
    %cst_63 = arith.constant dense<0.000000e+00> : vector<16xf32>
    %202 = vector.multi_reduction <add>, %201, %cst_63 [1] : vector<16x32xf32> to vector<16xf32>
    %203 = vector.shape_cast %202 : vector<16xf32> to vector<16x1xf32>
    %204 = tpu.transpose %199, [1, 0] : vector<16x1xf32> -> vector<1x16xf32>
    %205 = vector.broadcast %203 : vector<16x1xf32> to vector<16x16xf32>
    %206 = vector.broadcast %204 : vector<1x16xf32> to vector<16x16xf32>
    %207 = arith.addf %205, %206 : vector<16x16xf32>
    %cst_64 = arith.constant 0.000000e+00 : f32
    %208 = vector.broadcast %cst_64 : f32 to vector<16x16xf32>
    %209 = arith.cmpf ogt, %207, %208 : vector<16x16xf32>
    %cst_65 = arith.constant 2.000000e-01 : f32
    %210 = vector.broadcast %cst_65 : f32 to vector<16x16xf32>
    %211 = arith.mulf %210, %207 : vector<16x16xf32>
    %212 = arith.select %209, %207, %211 : vector<16x16xi1>, vector<16x16xf32>
    %cst_66 = arith.constant -1.000000e+30 : f32
    %213 = vector.broadcast %cst_66 : f32 to vector<16x16xf32>
    %214 = arith.select %2, %212, %213 : vector<16x16xi1>, vector<16x16xf32>
    %cst_67 = arith.constant dense<0xFF800000> : vector<16xf32>
    %215 = vector.multi_reduction <maximumf>, %214, %cst_67 [1] : vector<16x16xf32> to vector<16xf32>
    %216 = vector.shape_cast %215 : vector<16xf32> to vector<16x1xf32>
    %217 = vector.broadcast %216 : vector<16x1xf32> to vector<16x16xf32>
    %218 = arith.subf %214, %217 : vector<16x16xf32>
    %219 = math.exp %218 : vector<16x16xf32>
    %cst_68 = arith.constant 0.000000e+00 : f32
    %220 = vector.broadcast %cst_68 : f32 to vector<16x16xf32>
    %221 = arith.select %2, %219, %220 : vector<16x16xi1>, vector<16x16xf32>
    %cst_69 = arith.constant dense<0.000000e+00> : vector<16xf32>
    %222 = vector.multi_reduction <add>, %221, %cst_69 [1] : vector<16x16xf32> to vector<16xf32>
    %223 = vector.shape_cast %222 : vector<16xf32> to vector<16x1xf32>
    %cst_70 = arith.constant 0.000000e+00 : f32
    %224 = vector.broadcast %cst_70 : f32 to vector<16x1xf32>
    %225 = arith.cmpf ogt, %223, %224 : vector<16x1xf32>
    %cst_71 = arith.constant 1.000000e+00 : f32
    %226 = vector.broadcast %cst_71 : f32 to vector<16x1xf32>
    %227 = arith.select %225, %223, %226 : vector<16x1xi1>, vector<16x1xf32>
    %228 = arith.truncf %221 : vector<16x16xf32> to vector<16x16xbf16>
    %229 = arith.truncf %195 : vector<16x32xf32> to vector<16x32xbf16>
    %cst_72 = arith.constant dense<0.000000e+00> : vector<16x32xf32>
    %230 = tpu.matmul %228, %229, %cst_72 {dimension_numbers = #tpu.dot_dimension_numbers<[1], [0], [0], [1], [0, 0, 1, 1], [], []>} : vector<16x16xbf16>, vector<16x32xbf16>, vector<16x32xf32> -> vector<16x32xf32>
    %231 = vector.broadcast %227 : vector<16x1xf32> to vector<16x32xf32>
    %232 = arith.divf %230, %231 : vector<16x32xf32>
    %cst_73 = arith.constant 0.000000e+00 : f32
    %233 = vector.shape_cast %225 : vector<16x1xi1> to vector<16x1xi1>
    %234 = vector.broadcast %233 : vector<16x1xi1> to vector<16x32xi1>
    %235 = vector.broadcast %cst_73 : f32 to vector<16x32xf32>
    %236 = arith.select %234, %232, %235 : vector<16x32xi1>, vector<16x32xf32>
    %237 = vector.broadcast %189 : vector<1x32xf32> to vector<16x32xf32>
    %238 = arith.addf %236, %237 : vector<16x32xf32>
    %cst_74 = arith.constant dense<0.000000e+00> : vector<32xf32>
    %239 = vector.multi_reduction <add>, %238, %cst_74 [0] : vector<16x32xf32> to vector<32xf32>
    %240 = vector.shape_cast %239 : vector<32xf32> to vector<1x32xf32>
    %cst_75 = arith.constant 1.600000e+01 : f32
    %241 = vector.broadcast %cst_75 : f32 to vector<1x32xf32>
    %242 = arith.divf %240, %241 : vector<1x32xf32>
    %243 = arith.mulf %242, %192 : vector<1x32xf32>
    %244 = vector.broadcast %243 : vector<1x32xf32> to vector<16x32xf32>
    %245 = arith.subf %238, %244 : vector<16x32xf32>
    %246 = arith.mulf %245, %245 : vector<16x32xf32>
    %cst_76 = arith.constant dense<0.000000e+00> : vector<32xf32>
    %247 = vector.multi_reduction <add>, %246, %cst_76 [0] : vector<16x32xf32> to vector<32xf32>
    %248 = vector.shape_cast %247 : vector<32xf32> to vector<1x32xf32>
    %cst_77 = arith.constant 1.600000e+01 : f32
    %249 = vector.broadcast %cst_77 : f32 to vector<1x32xf32>
    %250 = arith.divf %248, %249 : vector<1x32xf32>
    %251 = vector.broadcast %190 : vector<1x32xf32> to vector<16x32xf32>
    %252 = arith.mulf %251, %245 : vector<16x32xf32>
    %cst_78 = arith.constant 9.99999974E-6 : f32
    %253 = vector.broadcast %cst_78 : f32 to vector<1x32xf32>
    %254 = arith.addf %250, %253 : vector<1x32xf32>
    %255 = math.rsqrt %254 : vector<1x32xf32>
    %256 = vector.broadcast %255 : vector<1x32xf32> to vector<16x32xf32>
    %257 = arith.mulf %252, %256 : vector<16x32xf32>
    %258 = vector.broadcast %191 : vector<1x32xf32> to vector<16x32xf32>
    %259 = arith.addf %257, %258 : vector<16x32xf32>
    %cst_79 = arith.constant 0.000000e+00 : f32
    %260 = vector.broadcast %cst_79 : f32 to vector<16x32xf32>
    %261 = arith.cmpf ogt, %259, %260 : vector<16x32xf32>
    %cst_80 = arith.constant 0.00999999977 : f32
    %262 = vector.broadcast %cst_80 : f32 to vector<16x32xf32>
    %263 = arith.mulf %262, %259 : vector<16x32xf32>
    %264 = arith.select %261, %259, %263 : vector<16x32xi1>, vector<16x32xf32>
    %c2_81 = arith.constant 2 : index
    %c0_82 = arith.constant 0 : index
    %c0_83 = arith.constant 0 : index
    %265 = vector.load %arg5[%c2_81, %c0_82, %c0_83] : memref<3x32x32xf32, #tpu.memory_space<vmem>>, vector<1x32x32xf32>
    %266 = vector.shape_cast %265 : vector<1x32x32xf32> to vector<32x32xf32>
    %c3 = arith.constant 3 : index
    %c0_84 = arith.constant 0 : index
    %c0_85 = arith.constant 0 : index
    %267 = vector.load %arg6[%c3, %c0_84, %c0_85] : memref<4x8x32xf32, #tpu.memory_space<vmem>>, vector<1x8x32xf32>
    %268 = vector.shape_cast %267 : vector<1x8x32xf32> to vector<8x32xf32>
    %269 = vector.extract_strided_slice %268 {offsets = [0, 0], sizes = [1, 32], strides = [1, 1]} : vector<8x32xf32> to vector<1x32xf32>
    %270 = vector.extract_strided_slice %268 {offsets = [1, 0], sizes = [1, 32], strides = [1, 1]} : vector<8x32xf32> to vector<1x32xf32>
    %271 = vector.extract_strided_slice %268 {offsets = [2, 0], sizes = [1, 32], strides = [1, 1]} : vector<8x32xf32> to vector<1x32xf32>
    %272 = vector.extract_strided_slice %268 {offsets = [3, 0], sizes = [1, 32], strides = [1, 1]} : vector<8x32xf32> to vector<1x32xf32>
    %273 = vector.extract_strided_slice %268 {offsets = [4, 0], sizes = [1, 32], strides = [1, 1]} : vector<8x32xf32> to vector<1x32xf32>
    %274 = vector.extract_strided_slice %268 {offsets = [5, 0], sizes = [1, 32], strides = [1, 1]} : vector<8x32xf32> to vector<1x32xf32>
    %275 = arith.truncf %264 : vector<16x32xf32> to vector<16x32xbf16>
    %276 = arith.truncf %266 : vector<32x32xf32> to vector<32x32xbf16>
    %cst_86 = arith.constant dense<0.000000e+00> : vector<16x32xf32>
    %277 = tpu.matmul %275, %276, %cst_86 {dimension_numbers = #tpu.dot_dimension_numbers<[1], [0], [0], [1], [0, 0, 1, 1], [], []>} : vector<16x32xbf16>, vector<32x32xbf16>, vector<16x32xf32> -> vector<16x32xf32>
    %278 = vector.broadcast %269 : vector<1x32xf32> to vector<16x32xf32>
    %279 = arith.mulf %277, %278 : vector<16x32xf32>
    %cst_87 = arith.constant dense<0.000000e+00> : vector<16xf32>
    %280 = vector.multi_reduction <add>, %279, %cst_87 [1] : vector<16x32xf32> to vector<16xf32>
    %281 = vector.shape_cast %280 : vector<16xf32> to vector<16x1xf32>
    %282 = vector.broadcast %270 : vector<1x32xf32> to vector<16x32xf32>
    %283 = arith.mulf %277, %282 : vector<16x32xf32>
    %cst_88 = arith.constant dense<0.000000e+00> : vector<16xf32>
    %284 = vector.multi_reduction <add>, %283, %cst_88 [1] : vector<16x32xf32> to vector<16xf32>
    %285 = vector.shape_cast %284 : vector<16xf32> to vector<16x1xf32>
    %286 = tpu.transpose %281, [1, 0] : vector<16x1xf32> -> vector<1x16xf32>
    %287 = vector.broadcast %285 : vector<16x1xf32> to vector<16x16xf32>
    %288 = vector.broadcast %286 : vector<1x16xf32> to vector<16x16xf32>
    %289 = arith.addf %287, %288 : vector<16x16xf32>
    %cst_89 = arith.constant 0.000000e+00 : f32
    %290 = vector.broadcast %cst_89 : f32 to vector<16x16xf32>
    %291 = arith.cmpf ogt, %289, %290 : vector<16x16xf32>
    %cst_90 = arith.constant 2.000000e-01 : f32
    %292 = vector.broadcast %cst_90 : f32 to vector<16x16xf32>
    %293 = arith.mulf %292, %289 : vector<16x16xf32>
    %294 = arith.select %291, %289, %293 : vector<16x16xi1>, vector<16x16xf32>
    %cst_91 = arith.constant -1.000000e+30 : f32
    %295 = vector.broadcast %cst_91 : f32 to vector<16x16xf32>
    %296 = arith.select %2, %294, %295 : vector<16x16xi1>, vector<16x16xf32>
    %cst_92 = arith.constant dense<0xFF800000> : vector<16xf32>
    %297 = vector.multi_reduction <maximumf>, %296, %cst_92 [1] : vector<16x16xf32> to vector<16xf32>
    %298 = vector.shape_cast %297 : vector<16xf32> to vector<16x1xf32>
    %299 = vector.broadcast %298 : vector<16x1xf32> to vector<16x16xf32>
    %300 = arith.subf %296, %299 : vector<16x16xf32>
    %301 = math.exp %300 : vector<16x16xf32>
    %cst_93 = arith.constant 0.000000e+00 : f32
    %302 = vector.broadcast %cst_93 : f32 to vector<16x16xf32>
    %303 = arith.select %2, %301, %302 : vector<16x16xi1>, vector<16x16xf32>
    %cst_94 = arith.constant dense<0.000000e+00> : vector<16xf32>
    %304 = vector.multi_reduction <add>, %303, %cst_94 [1] : vector<16x16xf32> to vector<16xf32>
    %305 = vector.shape_cast %304 : vector<16xf32> to vector<16x1xf32>
    %cst_95 = arith.constant 0.000000e+00 : f32
    %306 = vector.broadcast %cst_95 : f32 to vector<16x1xf32>
    %307 = arith.cmpf ogt, %305, %306 : vector<16x1xf32>
    %cst_96 = arith.constant 1.000000e+00 : f32
    %308 = vector.broadcast %cst_96 : f32 to vector<16x1xf32>
    %309 = arith.select %307, %305, %308 : vector<16x1xi1>, vector<16x1xf32>
    %310 = arith.truncf %303 : vector<16x16xf32> to vector<16x16xbf16>
    %311 = arith.truncf %277 : vector<16x32xf32> to vector<16x32xbf16>
    %cst_97 = arith.constant dense<0.000000e+00> : vector<16x32xf32>
    %312 = tpu.matmul %310, %311, %cst_97 {dimension_numbers = #tpu.dot_dimension_numbers<[1], [0], [0], [1], [0, 0, 1, 1], [], []>} : vector<16x16xbf16>, vector<16x32xbf16>, vector<16x32xf32> -> vector<16x32xf32>
    %313 = vector.broadcast %309 : vector<16x1xf32> to vector<16x32xf32>
    %314 = arith.divf %312, %313 : vector<16x32xf32>
    %cst_98 = arith.constant 0.000000e+00 : f32
    %315 = vector.shape_cast %307 : vector<16x1xi1> to vector<16x1xi1>
    %316 = vector.broadcast %315 : vector<16x1xi1> to vector<16x32xi1>
    %317 = vector.broadcast %cst_98 : f32 to vector<16x32xf32>
    %318 = arith.select %316, %314, %317 : vector<16x32xi1>, vector<16x32xf32>
    %319 = vector.broadcast %271 : vector<1x32xf32> to vector<16x32xf32>
    %320 = arith.addf %318, %319 : vector<16x32xf32>
    %cst_99 = arith.constant dense<0.000000e+00> : vector<32xf32>
    %321 = vector.multi_reduction <add>, %320, %cst_99 [0] : vector<16x32xf32> to vector<32xf32>
    %322 = vector.shape_cast %321 : vector<32xf32> to vector<1x32xf32>
    %cst_100 = arith.constant 1.600000e+01 : f32
    %323 = vector.broadcast %cst_100 : f32 to vector<1x32xf32>
    %324 = arith.divf %322, %323 : vector<1x32xf32>
    %325 = arith.mulf %324, %274 : vector<1x32xf32>
    %326 = vector.broadcast %325 : vector<1x32xf32> to vector<16x32xf32>
    %327 = arith.subf %320, %326 : vector<16x32xf32>
    %328 = arith.mulf %327, %327 : vector<16x32xf32>
    %cst_101 = arith.constant dense<0.000000e+00> : vector<32xf32>
    %329 = vector.multi_reduction <add>, %328, %cst_101 [0] : vector<16x32xf32> to vector<32xf32>
    %330 = vector.shape_cast %329 : vector<32xf32> to vector<1x32xf32>
    %cst_102 = arith.constant 1.600000e+01 : f32
    %331 = vector.broadcast %cst_102 : f32 to vector<1x32xf32>
    %332 = arith.divf %330, %331 : vector<1x32xf32>
    %333 = vector.broadcast %272 : vector<1x32xf32> to vector<16x32xf32>
    %334 = arith.mulf %333, %327 : vector<16x32xf32>
    %cst_103 = arith.constant 9.99999974E-6 : f32
    %335 = vector.broadcast %cst_103 : f32 to vector<1x32xf32>
    %336 = arith.addf %332, %335 : vector<1x32xf32>
    %337 = math.rsqrt %336 : vector<1x32xf32>
    %338 = vector.broadcast %337 : vector<1x32xf32> to vector<16x32xf32>
    %339 = arith.mulf %334, %338 : vector<16x32xf32>
    %340 = vector.broadcast %273 : vector<1x32xf32> to vector<16x32xf32>
    %341 = arith.addf %339, %340 : vector<16x32xf32>
    %cst_104 = arith.constant 0.000000e+00 : f32
    %342 = vector.broadcast %cst_104 : f32 to vector<16x32xf32>
    %343 = arith.cmpf ogt, %341, %342 : vector<16x32xf32>
    %cst_105 = arith.constant 0.00999999977 : f32
    %344 = vector.broadcast %cst_105 : f32 to vector<16x32xf32>
    %345 = arith.mulf %344, %341 : vector<16x32xf32>
    %346 = arith.select %343, %341, %345 : vector<16x32xi1>, vector<16x32xf32>
    %347 = tpu.concatenate %100, %182, %264, %346 in 1 : vector<16x32xf32>, vector<16x32xf32>, vector<16x32xf32>, vector<16x32xf32> -> vector<16x128xf32>
    %c0_106 = arith.constant 0 : index
    %c0_107 = arith.constant 0 : index
    %348 = vector.load %arg7[%c0_106, %c0_107] : memref<16x128xf32, #tpu.memory_space<vmem>>, vector<16x128xf32>
    tpu.vector_store %arg7[%c0_106, %c0_107], %347 {strides = array<i32>} : memref<16x128xf32, #tpu.memory_space<vmem>>, vector<16x128xf32>,
    return
  }
  func.func @transform_0(%arg0: i32) -> (i32, i32) {
    %c0_i32 = arith.constant 0 : i32
    %c0_i32_0 = arith.constant 0 : i32
    %c0_i32_1 = arith.constant 0 : i32
    return %c0_i32, %c0_i32_0 : i32, i32
  }
  func.func @transform_1(%arg0: i32) -> (i32, i32) {
    %c0_i32 = arith.constant 0 : i32
    %c0_i32_0 = arith.constant 0 : i32
    %c0_i32_1 = arith.constant 0 : i32
    return %c0_i32, %c0_i32_0 : i32, i32
  }
  func.func @transform_2(%arg0: i32) -> (i32, i32) {
    %c0_i32 = arith.constant 0 : i32
    %c0_i32_0 = arith.constant 0 : i32
    %c0_i32_1 = arith.constant 0 : i32
    return %c0_i32, %c0_i32_0 : i32, i32
  }
  func.func @transform_3(%arg0: i32) -> (i32, i32) {
    %c0_i32 = arith.constant 0 : i32
    %c0_i32_0 = arith.constant 0 : i32
    %c0_i32_1 = arith.constant 0 : i32
    return %c0_i32, %c0_i32_0 : i32, i32
  }
  func.func @transform_4(%arg0: i32) -> (i32, i32, i32) {
    %c0_i32 = arith.constant 0 : i32
    %c0_i32_0 = arith.constant 0 : i32
    %c0_i32_1 = arith.constant 0 : i32
    %c0_i32_2 = arith.constant 0 : i32
    return %c0_i32, %c0_i32_0, %c0_i32_1 : i32, i32, i32
  }
  func.func @transform_5(%arg0: i32) -> (i32, i32, i32) {
    %c0_i32 = arith.constant 0 : i32
    %c0_i32_0 = arith.constant 0 : i32
    %c0_i32_1 = arith.constant 0 : i32
    %c0_i32_2 = arith.constant 0 : i32
    return %c0_i32, %c0_i32_0, %c0_i32_1 : i32, i32, i32
  }
  func.func @transform_6(%arg0: i32) -> (i32, i32) {
    %c0_i32 = arith.constant 0 : i32
    %c0_i32_0 = arith.constant 0 : i32
    %c0_i32_1 = arith.constant 0 : i32
    return %c0_i32, %c0_i32_0 : i32, i32
  }
}

</mosaic_0001>

<bundles_post_ra>
// kernel: tpu_custom_call.1
= control target key start
LH: loop header
LB: loop body
LE: loop exit
PB: predicated region body
PF: predicated region fallthrough
CT: control target
= control target key end

     0   :  { %11 = vsyncpa [#allocation3], 0  ;;  %s1794_s0 = inlined_call_operand.vmem [shape: f32[16,8], index: 0, kind: input, shape index: {}]   ;;  %s1795_s1 = inlined_call_operand.hbm [shape: f32[16,16], index: 1, kind: input, shape index: {}]   ;;  %s1796_s2 = inlined_call_operand.hbm [shape: f32[4,8], index: 2, kind: input, shape index: {}]   ;;  %s1797_s3 = inlined_call_operand.vmem [shape: f32[8,32], index: 3, kind: input, shape index: {}]   ;;  %s1798_s4 = inlined_call_operand.hbm [shape: f32[3,32,32], index: 4, kind: input, shape index: {}]   ;;  %s1799_s5 = inlined_call_operand.vmem [shape: f32[4,8,32], index: 5, kind: input, shape index: {}]   ;;  %s1800_s6 = inlined_call_operand.hbm [shape: f32[16,128], index: 6, kind: output, shape index: {}]  }
   0x1   :  { %12 = vsyncpa [#allocation6], 0 }
   0x2   :  { %13 = vsyncpa [#allocation4], 0  ;;  %s1425_s21 = smov [#allocation5]   ;;  %s1426_s23 = smov [#allocation2]  }
   0x3   :  { %s34_s22 = sshll.u32 %s1425_s21, 4  ;;  %s21_s24 = sshll.u32 %s1426_s23, 4  ;;  %s35_s22 = int_to_ptr.vmem [resolvable:$true] %s34_s22  ;;  %s1471_s24 = int_to_ptr.vmem [resolvable:$true] %s21_s24 }
   0x4   :  { %s1331_s27 = scalar_lea.hbm %s1796_s2, 64 }
   0x5   :  { %p1332_p0 = scmp.ne.s32.totalorder %s1796_s2, %s1331_s27  ;;  %p1335_p1 = scmp.lt.u32.totalorder %s1331_s27, %s1796_s2 }
   0x7   :  { %p1337_p2 = pnand %p1335_p1, %p1332_p0 }
   0x9   :  { %1340 = shalt.err (!%p1337_p2)
}
   0xa   :  { %s1341_s8 = scalar_lea.vmem %s35_s22, 64  ;;  %p1346_p4 = scmp.lt.s32.totalorder %s35_s22, %s35_s22 }
   0xb   :  { %p1342_p3 = scmp.ne.s32.totalorder %s35_s22, %s1341_s8  ;;  %p1347_p5 = scmp.lt.s32.totalorder %s1341_s8, %s1341_s8 }
   0xd   :  { %p1348_p6 = por %p1347_p5, %p1346_p4 }
   0xf   :  { %p1349_p7 = pnand %p1348_p6, %p1342_p3 }
  0x11   :  { %1352 = shalt.err (!%p1349_p7)
}
  0x12   :  { %37 = dma.hbm_to_vmem [thread:$0]  %s1796_s2, 64, %s35_s22, [#allocation6]  }
  0x13   :  { %s1353_s13 = scalar_lea.hbm %s1795_s1, 256 }
  0x14   :  { %p1354_p8 = scmp.ne.s32.totalorder %s1795_s1, %s1353_s13  ;;  %p1357_p9 = scmp.lt.u32.totalorder %s1353_s13, %s1795_s1 }
  0x16   :  { %p1359_p10 = pnand %p1357_p9, %p1354_p8 }
  0x18   :  { %1362 = shalt.err (!%p1359_p10)
}
  0x19   :  { %s1363_s18 = scalar_lea.vmem %s1471_s24, 256  ;;  %p1368_p12 = scmp.lt.s32.totalorder %s1471_s24, %s1471_s24 }
  0x1a   :  { %p1364_p11 = scmp.ne.s32.totalorder %s1471_s24, %s1363_s18  ;;  %p1369_p13 = scmp.lt.s32.totalorder %s1363_s18, %s1363_s18 }
  0x1c   :  { %p1370_p0 = por %p1369_p13, %p1368_p12 }
  0x1e   :  { %p1371_p1 = pnand %p1370_p0, %p1364_p11 }
  0x20   :  { %1374 = shalt.err (!%p1371_p1)
}
  0x21   :  { %s1427_s2 = smov 128   ;;  %s1428_s19 = smov 8  }
  0x22   :  { %27 = dma.hbm_to_vmem [thread:$0]  %s1795_s1, 256, %s1471_s24, [#allocation3], %s1427_s2, %s1427_s2, %s1428_s19  }
  0x23   :  { %s1429_s22 = smov [#allocation7]   ;;  %s1375_s27 = scalar_lea.hbm %s1798_s4, 1536 }
  0x24   :  { %s45_s23 = sshll.u32 %s1429_s22, 4  ;;  %p1376_p2 = scmp.ne.s32.totalorder %s1798_s4, %s1375_s27  ;;  %s46_s23 = int_to_ptr.vmem [resolvable:$true] %s45_s23 }
  0x25   :  { %p1379_p3 = scmp.lt.u32.totalorder %s1375_s27, %s1798_s4 }
  0x27   :  { %p1381_p4 = pnand %p1379_p3, %p1376_p2 }
  0x29   :  { %1384 = shalt.err (!%p1381_p4)
}
  0x2a   :  { %s1385_s8 = scalar_lea.vmem %s46_s23, 1536  ;;  %p1390_p6 = scmp.lt.s32.totalorder %s46_s23, %s46_s23 }
  0x2b   :  { %p1386_p5 = scmp.ne.s32.totalorder %s46_s23, %s1385_s8  ;;  %p1391_p7 = scmp.lt.s32.totalorder %s1385_s8, %s1385_s8 }
  0x2d   :  { %p1392_p8 = por %p1391_p7, %p1390_p6 }
  0x2f   :  { %p1393_p9 = pnand %p1392_p8, %p1386_p5 }
  0x31   :  { %1396 = shalt.err (!%p1393_p9)
}
  0x32   :  { %51 = dma.hbm_to_vmem [thread:$0]  %s1798_s4, 1536, %s46_s23, [#allocation6], %s1427_s2, %s1427_s2, %s1428_s19  }
  0x33   :  { %1419 = dma.done.wait [#allocation3], 256  }
  0x34   :  { %1420 = vsyncadd [#allocation3], 4294967040 }
  0x35   :  { %1421 = dma.done.wait [#allocation6], 1600  }
  0x36   :  { %1422 = vsyncadd [#allocation6], 4294965696  ;;  %v1430_v0 = vmov 0.0   ;;  %vm1431_vm0 = vmmov 0   ;;  %v71_v1 = vlaneseq  ;;  %v97_v2 = vld [vmem:[%s1797_s3] sm:$0xff]  ;;  %vm105_vm1 = vcmask 1043456  }
  0x37   :  { %1224 = vmatprep.subr.bf16.mxu0 %v1430_v0  ;;  %1226 = vmatprep.mubr.msk.bf16.mxu0 %vm1431_vm0, %v1430_v0  ;;  %v68_v3 = vld [vmem:[#allocation5] sm:$0xf]  ;;  %v100_v5 = vpack.c.bf16 %v97_v2, %v97_v2  ;;  %v69_v10 = vld [vmem:[%s1794_s0] sm:$0xff]  ;;  %v70_v11 = vld [vmem:[%s1794_s0 + $0x8] sm:$0xff]  ;;  %vm101_vm2 = vcmask 64512   ;;  %vm156_vm3 = vcmask 261120  }
  0x38   :  { %1230 = vmatprep.subr.bf16.mxu1 %v1430_v0  ;;  %1232 = vmatprep.mubr.msk.bf16.mxu1 %vm1431_vm0, %v1430_v0  ;;  %v1529_v4 = vshrl.u32 %v71_v1, 7  ;;  %v77_v6 = vadd.f32 1e-05, %v68_v3  ;;  %v1559_v28 = vld [vmem:[%s1799_s5] sm:$0xff]  ;;  %v1574_v53 = vld [vmem:[#allocation2 + $0x8] sm:$0xff]  ;;  %vm221_vm7 = vcmask 130048  }
  0x39   :  { %v107_v7 = vsel %vm105_vm1, %v100_v5, 0  ;;  %v1571_v49 = vld [vmem:[#allocation2] sm:$0xff]  ;;  %vm67_vm8 = vcmp.gt.f32.partialorder %v1574_v53, 0.0  ;;  %s1433_s21 = smov 64   ;;  %s1434_s22 = smov 96  }
  0x3a   :  { %1289 = vrsqrt.f32 %v77_v6  ;;  %1225 = vmatpush3.bf16.msra.mxu0 %v107_v7  ;;  %v1532_v8 = vsub.s32 2, %v1529_v4  ;;  %v1543_v12 = vsub.s32 3, %v1529_v4  ;;  %v1546_v13 = vsub.s32 0, %v1529_v4  ;;  %s1435_s23 = smov [#allocation8]  }
  0x3b   :  { %1236 = vmatprep.subr.bf16.mxu0 %v1430_v0  ;;  %v1549_v16 = vsub.s32 1, %v1529_v4  ;;  %vm66_vm4 = vcmp.gt.f32.partialorder %v1571_v49, 0.0  ;;  %s1181_s25 = sshll.u32 %s1435_s23, 4  ;;  %s1182_s25 = int_to_ptr.vmem [resolvable:$true] %s1181_s25 }
  0x3c   :  { %v74_v9 = vrot.slane %v68_v3, %v1532_v8  ;;  %v88_v19 = vrot.slane %v68_v3, %v1546_v13  ;;  %v153_v30 = vrot.slane %v1559_v28, %v1546_v13  ;;  %s1397_s26 = scalar_lea.vmem %s1182_s25, 256  ;;  %p1402_p11 = scmp.lt.s32.totalorder %s1182_s25, %s1182_s25 }
  0x3d   :  { %v94_v22 = vrot.slane %v68_v3, %v1549_v16  ;;  %v166_v29 = vrot.slane %v1559_v28, %v1549_v16  ;;  %p1398_p10 = scmp.ne.s32.totalorder %s1182_s25, %s1397_s26  ;;  %p1403_p12 = scmp.lt.s32.totalorder %s1397_s26, %s1397_s26 }
  0x3e   :  { %v75_v14 = vsub.f32 %v69_v10, %v74_v9  ;;  %v76_v15 = vsub.f32 %v70_v11, %v74_v9 }
  0x3f   :  { %p1404_p13 = por %p1403_p12, %p1402_p11 }
  0x41   :  { %p1405_p0 = pnand %p1404_p13, %p1398_p10 }
  0x44   :  { %v1290_v17 = vpop.eup %1289 }
  0x45   :  { %v82_v18 = vrot.slane %v1290_v17, %v1543_v12  ;;  %v360_v17 = vld [vmem:[#allocation7] sm:$0xff] }
  0x47   :  { %v83_v20 = vmul.f32 %v82_v18, %v75_v14  ;;  %v84_v21 = vmul.f32 %v82_v18, %v76_v15  ;;  %v361_v18 = vld [vmem:[#allocation7 + $0x8] sm:$0xff] }
  0x49   :  { %v89_v23 = vmul.f32 %v88_v19, %v83_v20  ;;  %v90_v24 = vmul.f32 %v88_v19, %v84_v21  ;;  %v367_v19 = vpack.c.bf16 %v361_v18, %v360_v17  ;;  %v362_v20 = vld [vmem:[#allocation7 + $0x10] sm:$0xff]  ;;  %v363_v21 = vld [vmem:[#allocation7 + $0x18] sm:$0xff] }
  0x4b   :  { %v95_v25 = vadd.f32 %v94_v22, %v89_v23  ;;  %v96_v26 = vadd.f32 %v94_v22, %v90_v24  ;;  %v368_v22 = vpack.c.bf16 %v363_v21, %v362_v20 }
  0x4d   :  { %v99_v27 = vpack.c.bf16 %v96_v26, %v95_v25 }
  0x4f   :  { %1227 = vmatmul.mubr.msk.bf16.vlgmr.msra.gmra.mrb[0].mxu0 %vm101_vm2, %v99_v27 }
  0x50   :  { %1240 = vmatprep.mubr.msk.bf16.mxu0 %vm1431_vm0, %v1430_v0  ;;  %1237 = vmatpush3.bf16.msra.mxu0 %v367_v19 }
  0x51   :  { %1238 = vmatprep.subr.bf16.mxu0 %v1430_v0 }
  0x54   :  { %1239 = vmatpush3.bf16.msra.mxu0 %v368_v22 }
  0x55   :  { %1250 = vmatprep.subr.bf16.mxu0 %v1430_v0 }
 0x122   :  { %v143_v31 = vpop.f32.mrb[0].mxu0 }
 0x123   :  { %v1228_v32 = vpop.f32.mrb[1].mxu0  ;;  %v167_v33 = vmul.f32 %v166_v29, %v143_v31  ;;  %v154_v34 = vmul.f32 %v153_v30, %v143_v31 }
 0x124   :  { %v146_v35 = vpop.f32.mrb[2].mxu0 }
 0x125   :  { %v1229_v36 = vpop.f32.mrb[3].mxu0  ;;  %v169_v37 = vsel %vm156_vm3, %v167_v33, 0.0  ;;  %v157_v38 = vsel %vm156_vm3, %v154_v34, 0.0  ;;  %v247_v39 = vpack.c.bf16 %v146_v35, %v143_v31  ;;  %v168_v40 = vmul.f32 %v166_v29, %v146_v35 }
 0x126   :  { %170 = vadd.xlane.f32.xlu1 %v169_v37  ;;  %158 = vadd.xlane.f32.xlu0 %v157_v38  ;;  %v155_v41 = vmul.f32 %v153_v30, %v146_v35  ;;  %v305_v30 = vrot.slane %v1559_v28, %v1532_v8 }
 0x127   :  { %1231 = vmatpush3.bf16.msra.mxu1 %v247_v39  ;;  %v172_v42 = vsel %vm156_vm3, %v168_v40, 0.0 }
 0x128   :  { %1244 = vmatprep.subr.bf16.mxu1 %v1430_v0  ;;  %v160_v43 = vsel %vm156_vm3, %v155_v41, 0.0 }
 0x12a   :  { %173 = vadd.xlane.f32.xlu1 %v172_v42  ;;  %161 = vadd.xlane.f32.xlu0 %v160_v43 }
 0x1b3   :  { %v159_v44 = vpop.xlane.xlu0 %158  ;;  %v171_v46 = vpop.xlane.xlu1 %170 }
 0x1b4   :  { %175 = vxpose.xlu0.b32.start [1/2] (short) (narrow) %v159_v44, 8 }
 0x1b7   :  { %v162_v45 = vpop.xlane.xlu0 %161  ;;  %v174_v50 = vpop.xlane.xlu1 %173 }
 0x1b8   :  { %176 = vxpose.xlu0.b32.end [2/2] (short) (narrow) %v162_v45, 8 }
 0x234   :  { %v191_v47 = vpop.trf.xlu0 }
 0x235   :  { %v210_v48 = vrot.slane %v191_v47, %v1546_v13 }
 0x237   :  { %v211_v51 = vadd.f32 %v210_v48, %v171_v46  ;;  %v212_v52 = vadd.f32 %v210_v48, %v174_v50 }
 0x239   :  { %vm213_vm5 = vcmp.gt.f32.partialorder %v211_v51, 0.0  ;;  %v215_v54 = vmul.f32 0.2, %v211_v51  ;;  %vm214_vm6 = vcmp.gt.f32.partialorder %v212_v52, 0.0  ;;  %v216_v55 = vmul.f32 0.2, %v212_v52 }
 0x23b   :  { %v217_v56 = vsel %vm213_vm5, %v211_v51, %v215_v54  ;;  %v218_v57 = vsel %vm214_vm6, %v212_v52, %v216_v55  ;;  %v1601_v52 = vsub.s32 5, %v1529_v4 }
 0x23c   :  { %v219_v58 = vsel %vm66_vm4, %v217_v56, -1e+30  ;;  %v220_v60 = vsel %vm67_vm8, %v218_v57, -1e+30 }
 0x23d   :  { %v222_v59 = vsel %vm221_vm7, %v219_v58, -inf  ;;  %v225_v61 = vsel %vm221_vm7, %v220_v60, -inf }
 0x23e   :  { %223 = vmax.xlane.f32.xlu1 %v222_v59 }
 0x242   :  { %226 = vmax.xlane.f32.xlu1 %v225_v61 }
 0x2cb   :  { %v224_v62 = vpop.xlane.xlu1 %223 }
 0x2cc   :  { %v228_v63 = vsub.f32 %v219_v58, %v224_v62 }
 0x2ce   :  { %v230_v1 = vmul.f32 1.442695, %v228_v63 }
 0x2cf   :  { %v227_v2 = vpop.xlane.xlu1 %226 }
 0x2d0   :  { %1291 = vpow2.f32 %v230_v1  ;;  %v229_v3 = vsub.f32 %v220_v60, %v227_v2 }
 0x2d2   :  { %v232_v5 = vmul.f32 1.442695, %v229_v3 }
 0x2d4   :  { %1293 = vpow2.f32 %v232_v5 }
 0x2da   :  { %v1292_v6 = vpop.eup %1291 }
 0x2db   :  { %v234_v7 = vsel %vm66_vm4, %v1292_v6, 0.0 }
 0x2dc   :  { %v236_v9 = vsel %vm221_vm7, %v234_v7, 0.0 }
 0x2dd   :  { %237 = vadd.xlane.f32.xlu1 %v236_v9 }
 0x2de   :  { %v1294_v10 = vpop.eup %1293 }
 0x2df   :  { %v235_v11 = vsel %vm67_vm8, %v1294_v10, 0.0  ;;  %v341_v10 = vrot.slane %v1559_v28, %v1543_v12 }
 0x2e0   :  { %v239_v14 = vsel %vm221_vm7, %v235_v11, 0.0  ;;  %v246_v15 = vpack.c.bf16 %v235_v11, %v234_v7  ;;  %v1610_v11 = vsub.s32 4, %v1529_v4 }
 0x2e1   :  { %240 = vadd.xlane.f32.xlu1 %v239_v14 }
 0x2e2   :  { %1233 = vmatmul.mubr.msk.bf16.vlgmr.msra.gmra.mrb[0].mxu1 %vm221_vm7, %v246_v15  ;;  %v351_v17 = vrot.slane %v1559_v28, %v1610_v11 }
 0x2e3   :  { %1246 = vmatprep.mubr.msk.bf16.mxu1 %vm1431_vm0, %v1430_v0 }
 0x36a   :  { %v238_v23 = vpop.xlane.xlu1 %237 }
 0x36b   :  { %vm242_vm9 = vcmp.gt.f32.partialorder %v238_v23, 0.0 }
 0x36c   :  { %v244_v25 = vsel %vm242_vm9, %v238_v23, 1.0 }
 0x36d   :  { %1295 = vrcp.f32 %v244_v25 }
 0x36e   :  { %v241_v24 = vpop.xlane.xlu1 %240 }
 0x36f   :  { %vm243_vm10 = vcmp.gt.f32.partialorder %v241_v24, 0.0 }
 0x370   :  { %v245_v26 = vsel %vm243_vm10, %v241_v24, 1.0 }
 0x371   :  { %1297 = vrcp.f32 %v245_v26 }
 0x377   :  { %v1296_v27 = vpop.eup %1295 }
 0x37b   :  { %v1298_v33 = vpop.eup %1297 }
 0x3b5   :  { %v285_v29 = vpop.f32.mrb[0].mxu1 }
 0x3b6   :  { %v293_v31 = vmul.f32 %v1296_v27, %v285_v29  ;;  %v1234_v32 = vpop.f32.mrb[1].mxu1 }
 0x3b7   :  { %v288_v34 = vpop.f32.mrb[2].mxu1 }
 0x3b8   :  { %v300_v35 = vsel %vm242_vm9, %v293_v31, 0.0  ;;  %v295_v36 = vmul.f32 %v1298_v33, %v288_v34  ;;  %v1235_v37 = vpop.f32.mrb[3].mxu1 }
 0x3b9   :  { %v306_v38 = vadd.f32 %v305_v30, %v300_v35 }
 0x3ba   :  { %v301_v39 = vsel %vm243_vm10, %v295_v36, 0.0 }
 0x3bb   :  { %v307_v40 = vadd.f32 %v305_v30, %v301_v39  ;;  %v308_v41 = vsel %vm156_vm3, %v306_v38, 0.0 }
 0x3bd   :  { %v309_v42 = vsel %vm156_vm3, %v307_v40, 0.0 }
 0x3be   :  { %v310_v43 = vadd.f32 %v309_v42, %v308_v41 }
 0x3c0   :  { %v311_v44 = vrot.slane %v310_v43, 4 }
 0x3c2   :  { %v312_v45 = vadd.f32 %v311_v44, %v310_v43 }
 0x3c4   :  { %v313_v46 = vrot.slane %v312_v45, 2 }
 0x3c6   :  { %v314_v47 = vadd.f32 %v313_v46, %v312_v45 }
 0x3c8   :  { %v315_v48 = vrot.slane %v314_v47, 1 }
 0x3ca   :  { %v316_v50 = vadd.f32 %v315_v48, %v314_v47 }
 0x3cc   :  { %v318_v51 = vmul.f32 0.0625, %v316_v50 }
 0x3ce   :  { %v319_v54 = vmul.f32 %v318_v51, %v1559_v28  ;;  %v1626_v28 = vld [vmem:[%s1799_s5 + $0x8] sm:$0xff] }
 0x3cf   :  { %v416_v27 = vrot.slane %v1626_v28, %v1546_v13  ;;  %v428_v37 = vrot.slane %v1626_v28, %v1549_v16 }
 0x3d0   :  { %v323_v55 = vrot.slane %v319_v54, %v1601_v52 }
 0x3d2   :  { %v324_v56 = vsub.f32 %v306_v38, %v323_v55  ;;  %v325_v57 = vsub.f32 %v307_v40, %v323_v55 }
 0x3d4   :  { %v326_v58 = vmul.f32 %v324_v56, %v324_v56  ;;  %v327_v59 = vmul.f32 %v325_v57, %v325_v57  ;;  %v342_v14 = vmul.f32 %v341_v10, %v324_v56  ;;  %v343_v15 = vmul.f32 %v341_v10, %v325_v57 }
 0x3d6   :  { %v328_v60 = vsel %vm156_vm3, %v326_v58, 0.0  ;;  %v329_v61 = vsel %vm156_vm3, %v327_v59, 0.0 }
 0x3d7   :  { %v330_v62 = vadd.f32 %v329_v61, %v328_v60 }
 0x3d9   :  { %v331_v63 = vrot.slane %v330_v62, 4 }
 0x3db   :  { %v332_v1 = vadd.f32 %v331_v63, %v330_v62 }
 0x3dd   :  { %v333_v2 = vrot.slane %v332_v1, 2 }
 0x3df   :  { %v334_v3 = vadd.f32 %v333_v2, %v332_v1 }
 0x3e1   :  { %v335_v5 = vrot.slane %v334_v3, 1 }
 0x3e3   :  { %v336_v6 = vadd.f32 %v335_v5, %v334_v3 }
 0x3e5   :  { %v337_v7 = vmul.f32 0.0625, %v336_v6 }
 0x3e7   :  { %v344_v9 = vadd.f32 1e-05, %v337_v7 }
 0x3e9   :  { %1299 = vrsqrt.f32 %v344_v9 }
 0x3f3   :  { %v1300_v18 = vpop.eup %1299 }
 0x3f4   :  { %v346_v19 = vmul.f32 %v1300_v18, %v342_v14  ;;  %v347_v20 = vmul.f32 %v1300_v18, %v343_v15  ;;  %v621_v18 = vld [vmem:[#allocation7 + $0x20] sm:$0xff] }
 0x3f6   :  { %v352_v21 = vadd.f32 %v351_v17, %v346_v19  ;;  %v353_v22 = vadd.f32 %v351_v17, %v347_v20  ;;  %v622_v19 = vld [vmem:[#allocation7 + $0x28] sm:$0xff] }
 0x3f7   :  { %v628_v20 = vpack.c.bf16 %v622_v19, %v621_v18  ;;  %v611_v19 = vrot.slane %v1626_v28, %v1610_v11 }
 0x3f8   :  { %v357_v23 = vmul.f32 0.01, %v353_v22  ;;  %vm354_vm11 = vcmp.gt.f32.partialorder %v352_v21, 0.0  ;;  %vm355_vm12 = vcmp.gt.f32.partialorder %v353_v22, 0.0  ;;  %v356_v24 = vmul.f32 0.01, %v352_v21 }
 0x3fa   :  { %v1614_v25 = vsel %vm354_vm11, %v352_v21, %v356_v24  ;;  %v1616_v26 = vsel %vm355_vm12, %v353_v22, %v357_v23  ;;  %v623_v21 = vld [vmem:[#allocation7 + $0x30] sm:$0xff]  ;;  %v624_v22 = vld [vmem:[#allocation7 + $0x38] sm:$0xff] }
 0x3fb   :  { %v366_v4 = vpack.c.bf16 %v1616_v26, %v1614_v25  ;;  %v629_v23 = vpack.c.bf16 %v624_v22, %v623_v21 }
 0x3fd   :  { %1241 = vmatmul.mubr.msk.bf16.vlgmr.msra.gmra.mrb[4].mxu0 %vm156_vm3, %v366_v4 }
 0x3fe   :  { %1254 = vmatprep.mubr.msk.bf16.mxu0 %vm1431_vm0, %v1430_v0  ;;  %1251 = vmatpush3.bf16.msra.mxu0 %v628_v20 }
 0x3ff   :  { %1252 = vmatprep.subr.bf16.mxu0 %v1430_v0 }
 0x402   :  { %1253 = vmatpush3.bf16.msra.mxu0 %v629_v23 }
 0x403   :  { %1264 = vmatprep.subr.bf16.mxu0 %v1430_v0 }
 0x4d0   :  { %v406_v29 = vpop.f32.mrb[4].mxu0 }
 0x4d1   :  { %v1242_v30 = vpop.f32.mrb[5].mxu0  ;;  %v417_v31 = vmul.f32 %v416_v27, %v406_v29  ;;  %v429_v39 = vmul.f32 %v428_v37, %v406_v29 }
 0x4d2   :  { %v409_v32 = vpop.f32.mrb[6].mxu0 }
 0x4d3   :  { %v508_v33 = vpack.c.bf16 %v409_v32, %v406_v29  ;;  %v1243_v34 = vpop.f32.mrb[7].mxu0  ;;  %v419_v35 = vsel %vm156_vm3, %v417_v31, 0.0  ;;  %v418_v36 = vmul.f32 %v416_v27, %v409_v32  ;;  %v431_v40 = vsel %vm156_vm3, %v429_v39, 0.0 }
 0x4d4   :  { %420 = vadd.xlane.f32.xlu1 %v419_v35  ;;  %v430_v41 = vmul.f32 %v428_v37, %v409_v32  ;;  %v566_v32 = vrot.slane %v1626_v28, %v1532_v8 }
 0x4d5   :  { %1245 = vmatpush3.bf16.msra.mxu1 %v508_v33  ;;  %v422_v38 = vsel %vm156_vm3, %v418_v36, 0.0 }
 0x4d6   :  { %1258 = vmatprep.subr.bf16.mxu1 %v1430_v0  ;;  %v434_v42 = vsel %vm156_vm3, %v430_v41, 0.0 }
 0x4d8   :  { %423 = vadd.xlane.f32.xlu1 %v422_v38 }
 0x4dc   :  { %432 = vadd.xlane.f32.xlu1 %v431_v40 }
 0x4e0   :  { %435 = vadd.xlane.f32.xlu1 %v434_v42 }
 0x561   :  { %v421_v43 = vpop.xlane.xlu1 %420 }
 0x562   :  { %437 = vxpose.xlu1.b32.start [1/2] (short) (narrow) %v421_v43, 8 }
 0x565   :  { %v424_v44 = vpop.xlane.xlu1 %423 }
 0x566   :  { %438 = vxpose.xlu1.b32.end [2/2] (short) (narrow) %v424_v44, 8 }
 0x569   :  { %v433_v45 = vpop.xlane.xlu1 %432 }
 0x56d   :  { %v436_v46 = vpop.xlane.xlu1 %435 }
 0x5e2   :  { %v453_v47 = vpop.trf.xlu1 }
 0x5e3   :  { %v472_v48 = vrot.slane %v453_v47, %v1546_v13 }
 0x5e5   :  { %v473_v50 = vadd.f32 %v472_v48, %v433_v45  ;;  %v474_v51 = vadd.f32 %v472_v48, %v436_v46 }
 0x5e7   :  { %vm476_vm13 = vcmp.gt.f32.partialorder %v474_v51, 0.0  ;;  %v478_v54 = vmul.f32 0.2, %v474_v51  ;;  %vm475_vm14 = vcmp.gt.f32.partialorder %v473_v50, 0.0  ;;  %v477_v55 = vmul.f32 0.2, %v473_v50 }
 0x5e9   :  { %v480_v56 = vsel %vm476_vm13, %v474_v51, %v478_v54  ;;  %v479_v57 = vsel %vm475_vm14, %v473_v50, %v477_v55 }
 0x5ea   :  { %v482_v58 = vsel %vm67_vm8, %v480_v56, -1e+30  ;;  %v481_v59 = vsel %vm66_vm4, %v479_v57, -1e+30 }
 0x5eb   :  { %v486_v60 = vsel %vm221_vm7, %v482_v58, -inf  ;;  %v483_v61 = vsel %vm221_vm7, %v481_v59, -inf }
 0x5ec   :  { %487 = vmax.xlane.f32.xlu1 %v486_v60  ;;  %484 = vmax.xlane.f32.xlu0 %v483_v61 }
 0x679   :  { %v488_v62 = vpop.xlane.xlu1 %487  ;;  %v485_v63 = vpop.xlane.xlu0 %484 }
 0x67a   :  { %v490_v1 = vsub.f32 %v482_v58, %v488_v62  ;;  %v489_v2 = vsub.f32 %v481_v59, %v485_v63 }
 0x67c   :  { %v493_v3 = vmul.f32 1.442695, %v490_v1  ;;  %v491_v5 = vmul.f32 1.442695, %v489_v2 }
 0x67e   :  { %1301 = vpow2.f32 %v493_v3 }
 0x67f   :  { %1303 = vpow2.f32 %v491_v5 }
 0x688   :  { %v1302_v6 = vpop.eup %1301 }
 0x689   :  { %v1304_v7 = vpop.eup %1303  ;;  %v496_v9 = vsel %vm67_vm8, %v1302_v6, 0.0 }
 0x68a   :  { %v495_v10 = vsel %vm66_vm4, %v1304_v7, 0.0  ;;  %v500_v17 = vsel %vm221_vm7, %v496_v9, 0.0 }
 0x68b   :  { %v497_v14 = vsel %vm221_vm7, %v495_v10, 0.0  ;;  %v507_v15 = vpack.c.bf16 %v496_v9, %v495_v10 }
 0x68c   :  { %498 = vadd.xlane.f32.xlu0 %v497_v14 }
 0x68d   :  { %1247 = vmatmul.mubr.msk.bf16.vlgmr.msra.gmra.mrb[4].mxu1 %vm221_vm7, %v507_v15  ;;  %v601_v15 = vrot.slane %v1626_v28, %v1543_v12 }
 0x68e   :  { %1260 = vmatprep.mubr.msk.bf16.mxu1 %vm1431_vm0, %v1430_v0 }
 0x690   :  { %501 = vadd.xlane.f32.xlu0 %v500_v17 }
 0x719   :  { %v499_v24 = vpop.xlane.xlu0 %498 }
 0x71a   :  { %vm503_vm15 = vcmp.gt.f32.partialorder %v499_v24, 0.0 }
 0x71b   :  { %v505_v27 = vsel %vm503_vm15, %v499_v24, 1.0 }
 0x71c   :  { %1305 = vrcp.f32 %v505_v27 }
 0x71d   :  { %v502_v4 = vpop.xlane.xlu0 %501 }
 0x71e   :  { %vm504_vm1 = vcmp.gt.f32.partialorder %v502_v4, 0.0 }
 0x71f   :  { %v506_v29 = vsel %vm504_vm1, %v502_v4, 1.0 }
 0x720   :  { %1307 = vrcp.f32 %v506_v29 }
 0x726   :  { %v1306_v30 = vpop.eup %1305 }
 0x72a   :  { %v1308_v35 = vpop.eup %1307 }
 0x760   :  { %v546_v31 = vpop.f32.mrb[4].mxu1 }
 0x761   :  { %v554_v33 = vmul.f32 %v1306_v30, %v546_v31  ;;  %v1248_v34 = vpop.f32.mrb[5].mxu1 }
 0x762   :  { %v549_v36 = vpop.f32.mrb[6].mxu1 }
 0x763   :  { %v561_v37 = vsel %vm503_vm15, %v554_v33, 0.0  ;;  %v556_v38 = vmul.f32 %v1308_v35, %v549_v36  ;;  %v1249_v39 = vpop.f32.mrb[7].mxu1 }
 0x764   :  { %v567_v40 = vadd.f32 %v566_v32, %v561_v37 }
 0x765   :  { %v562_v41 = vsel %vm504_vm1, %v556_v38, 0.0  ;;  %vm1168_vm1 = vcmask 523264  }
 0x766   :  { %v568_v42 = vadd.f32 %v566_v32, %v562_v41  ;;  %v569_v43 = vsel %vm156_vm3, %v567_v40, 0.0 }
 0x768   :  { %v570_v44 = vsel %vm156_vm3, %v568_v42, 0.0 }
 0x769   :  { %v571_v45 = vadd.f32 %v570_v44, %v569_v43 }
 0x76b   :  { %v572_v46 = vrot.slane %v571_v45, 4 }
 0x76d   :  { %v573_v47 = vadd.f32 %v572_v46, %v571_v45 }
 0x76f   :  { %v574_v48 = vrot.slane %v573_v47, 2 }
 0x771   :  { %v575_v50 = vadd.f32 %v574_v48, %v573_v47 }
 0x773   :  { %v576_v51 = vrot.slane %v575_v50, 1 }
 0x775   :  { %v577_v54 = vadd.f32 %v576_v51, %v575_v50 }
 0x777   :  { %v578_v55 = vmul.f32 0.0625, %v577_v54 }
 0x779   :  { %v579_v56 = vmul.f32 %v1626_v28, %v578_v55  ;;  %v1681_v28 = vld [vmem:[%s1799_s5 + $0x10] sm:$0xff] }
 0x77a   :  { %v677_v32 = vrot.slane %v1681_v28, %v1546_v13  ;;  %v689_v41 = vrot.slane %v1681_v28, %v1549_v16 }
 0x77b   :  { %v583_v57 = vrot.slane %v579_v56, %v1601_v52 }
 0x77d   :  { %v584_v58 = vsub.f32 %v567_v40, %v583_v57  ;;  %v585_v59 = vsub.f32 %v568_v42, %v583_v57 }
 0x77f   :  { %v586_v60 = vmul.f32 %v584_v58, %v584_v58  ;;  %v587_v61 = vmul.f32 %v585_v59, %v585_v59  ;;  %v602_v17 = vmul.f32 %v601_v15, %v584_v58  ;;  %v603_v18 = vmul.f32 %v601_v15, %v585_v59 }
 0x781   :  { %v588_v62 = vsel %vm156_vm3, %v586_v60, 0.0  ;;  %v589_v63 = vsel %vm156_vm3, %v587_v61, 0.0 }
 0x782   :  { %v590_v1 = vadd.f32 %v589_v63, %v588_v62 }
 0x784   :  { %v591_v2 = vrot.slane %v590_v1, 4 }
 0x786   :  { %v592_v3 = vadd.f32 %v591_v2, %v590_v1 }
 0x788   :  { %v593_v5 = vrot.slane %v592_v3, 2 }
 0x78a   :  { %v594_v6 = vadd.f32 %v593_v5, %v592_v3 }
 0x78c   :  { %v595_v7 = vrot.slane %v594_v6, 1 }
 0x78e   :  { %v596_v9 = vadd.f32 %v595_v7, %v594_v6 }
 0x790   :  { %v597_v10 = vmul.f32 0.0625, %v596_v9 }
 0x792   :  { %v604_v14 = vadd.f32 1e-05, %v597_v10 }
 0x794   :  { %1309 = vrsqrt.f32 %v604_v14 }
 0x79e   :  { %v1310_v20 = vpop.eup %1309 }
 0x79f   :  { %v606_v21 = vmul.f32 %v1310_v20, %v602_v17  ;;  %v607_v22 = vmul.f32 %v1310_v20, %v603_v18 }
 0x7a1   :  { %v612_v23 = vadd.f32 %v611_v19, %v606_v21  ;;  %v613_v24 = vadd.f32 %v611_v19, %v607_v22  ;;  %v882_v22 = vld [vmem:[#allocation7 + $0x40] sm:$0xff] }
 0x7a3   :  { %v617_v4 = vmul.f32 0.01, %v613_v24  ;;  %vm614_vm2 = vcmp.gt.f32.partialorder %v612_v23, 0.0  ;;  %vm615_vm5 = vcmp.gt.f32.partialorder %v613_v24, 0.0  ;;  %v616_v27 = vmul.f32 0.01, %v612_v23 }
 0x7a5   :  { %v1669_v29 = vsel %vm614_vm2, %v612_v23, %v616_v27  ;;  %v1671_v30 = vsel %vm615_vm5, %v613_v24, %v617_v4  ;;  %v883_v23 = vld [vmem:[#allocation7 + $0x48] sm:$0xff]  ;;  %v884_v4 = vld [vmem:[#allocation7 + $0x50] sm:$0xff]  ;;  %v885_v27 = vld [vmem:[#allocation7 + $0x58] sm:$0xff]  ;;  %vm1171_vm2 = vcmask 785408  }
 0x7a6   :  { %v627_v31 = vpack.c.bf16 %v1671_v30, %v1669_v29  ;;  %v889_v24 = vpack.c.bf16 %v883_v23, %v882_v22 }
 0x7a8   :  { %1255 = vmatmul.mubr.msk.bf16.vlgmr.msra.gmra.mrb[8].mxu0 %vm156_vm3, %v627_v31  ;;  %v890_v31 = vpack.c.bf16 %v885_v27, %v884_v4 }
 0x7a9   :  { %1268 = vmatprep.mubr.msk.bf16.mxu0 %vm1431_vm0, %v1430_v0  ;;  %1265 = vmatpush3.bf16.msra.mxu0 %v889_v24  ;;  %v872_v24 = vrot.slane %v1681_v28, %v1610_v11 }
 0x7aa   :  { %1266 = vmatprep.subr.bf16.mxu0 %v1430_v0 }
 0x7ad   :  { %1267 = vmatpush3.bf16.msra.mxu0 %v890_v31 }
 0x87b   :  { %v667_v33 = vpop.f32.mrb[8].mxu0 }
 0x87c   :  { %v1256_v34 = vpop.f32.mrb[9].mxu0  ;;  %v678_v35 = vmul.f32 %v677_v32, %v667_v33  ;;  %v690_v43 = vmul.f32 %v689_v41, %v667_v33 }
 0x87d   :  { %v670_v36 = vpop.f32.mrb[10].mxu0 }
 0x87e   :  { %v769_v37 = vpack.c.bf16 %v670_v36, %v667_v33  ;;  %v1257_v38 = vpop.f32.mrb[11].mxu0  ;;  %v680_v39 = vsel %vm156_vm3, %v678_v35, 0.0  ;;  %v679_v40 = vmul.f32 %v677_v32, %v670_v36  ;;  %v692_v44 = vsel %vm156_vm3, %v690_v43, 0.0 }
 0x87f   :  { %681 = vadd.xlane.f32.xlu0 %v680_v39  ;;  %v691_v45 = vmul.f32 %v689_v41, %v670_v36  ;;  %v827_v38 = vrot.slane %v1681_v28, %v1532_v8 }
 0x880   :  { %1259 = vmatpush3.bf16.msra.mxu1 %v769_v37  ;;  %v683_v42 = vsel %vm156_vm3, %v679_v40, 0.0 }
 0x881   :  { %1272 = vmatprep.subr.bf16.mxu1 %v1430_v0  ;;  %v695_v46 = vsel %vm156_vm3, %v691_v45, 0.0 }
 0x883   :  { %684 = vadd.xlane.f32.xlu0 %v683_v42 }
 0x887   :  { %693 = vadd.xlane.f32.xlu0 %v692_v44 }
 0x88b   :  { %696 = vadd.xlane.f32.xlu0 %v695_v46 }
 0x90c   :  { %v682_v47 = vpop.xlane.xlu0 %681 }
 0x90d   :  { %698 = vxpose.xlu0.b32.start [1/2] (short) (narrow) %v682_v47, 8 }
 0x910   :  { %v685_v48 = vpop.xlane.xlu0 %684 }
 0x911   :  { %699 = vxpose.xlu0.b32.end [2/2] (short) (narrow) %v685_v48, 8 }
 0x914   :  { %v694_v50 = vpop.xlane.xlu0 %693 }
 0x918   :  { %v697_v51 = vpop.xlane.xlu0 %696 }
 0x98d   :  { %v714_v54 = vpop.trf.xlu0 }
 0x98e   :  { %v733_v55 = vrot.slane %v714_v54, %v1546_v13 }
 0x990   :  { %v734_v56 = vadd.f32 %v733_v55, %v694_v50  ;;  %v735_v57 = vadd.f32 %v733_v55, %v697_v51 }
 0x992   :  { %vm736_vm6 = vcmp.gt.f32.partialorder %v734_v56, 0.0  ;;  %v738_v58 = vmul.f32 0.2, %v734_v56  ;;  %vm737_vm9 = vcmp.gt.f32.partialorder %v735_v57, 0.0  ;;  %v739_v59 = vmul.f32 0.2, %v735_v57 }
 0x994   :  { %v740_v60 = vsel %vm736_vm6, %v734_v56, %v738_v58  ;;  %v741_v61 = vsel %vm737_vm9, %v735_v57, %v739_v59 }
 0x995   :  { %v742_v62 = vsel %vm66_vm4, %v740_v60, -1e+30  ;;  %v743_v1 = vsel %vm67_vm8, %v741_v61, -1e+30 }
 0x996   :  { %v744_v63 = vsel %vm221_vm7, %v742_v62, -inf  ;;  %v747_v2 = vsel %vm221_vm7, %v743_v1, -inf }
 0x997   :  { %745 = vmax.xlane.f32.xlu1 %v744_v63 }
 0x99b   :  { %748 = vmax.xlane.f32.xlu1 %v747_v2 }
 0xa24   :  { %v746_v3 = vpop.xlane.xlu1 %745 }
 0xa25   :  { %v750_v5 = vsub.f32 %v742_v62, %v746_v3 }
 0xa27   :  { %v752_v6 = vmul.f32 1.442695, %v750_v5 }
 0xa28   :  { %v749_v7 = vpop.xlane.xlu1 %748 }
 0xa29   :  { %1311 = vpow2.f32 %v752_v6  ;;  %v751_v9 = vsub.f32 %v743_v1, %v749_v7 }
 0xa2b   :  { %v754_v10 = vmul.f32 1.442695, %v751_v9 }
 0xa2d   :  { %1313 = vpow2.f32 %v754_v10 }
 0xa33   :  { %v1312_v14 = vpop.eup %1311 }
 0xa34   :  { %v756_v15 = vsel %vm66_vm4, %v1312_v14, 0.0 }
 0xa35   :  { %v758_v17 = vsel %vm221_vm7, %v756_v15, 0.0 }
 0xa36   :  { %759 = vadd.xlane.f32.xlu1 %v758_v17 }
 0xa37   :  { %v1314_v18 = vpop.eup %1313 }
 0xa38   :  { %v757_v19 = vsel %vm67_vm8, %v1314_v18, 0.0 }
 0xa39   :  { %v761_v20 = vsel %vm221_vm7, %v757_v19, 0.0  ;;  %v768_v21 = vpack.c.bf16 %v757_v19, %v756_v15 }
 0xa3a   :  { %762 = vadd.xlane.f32.xlu1 %v761_v20 }
 0xa3b   :  { %1261 = vmatmul.mubr.msk.bf16.vlgmr.msra.gmra.mrb[8].mxu1 %vm221_vm7, %v768_v21  ;;  %v862_v21 = vrot.slane %v1681_v28, %v1543_v12 }
 0xa3c   :  { %1274 = vmatprep.mubr.msk.bf16.mxu1 %vm1431_vm0, %v1430_v0 }
 0xac3   :  { %v760_v32 = vpop.xlane.xlu1 %759 }
 0xac4   :  { %vm764_vm10 = vcmp.gt.f32.partialorder %v760_v32, 0.0 }
 0xac5   :  { %v766_v34 = vsel %vm764_vm10, %v760_v32, 1.0 }
 0xac6   :  { %1315 = vrcp.f32 %v766_v34 }
 0xac7   :  { %v763_v33 = vpop.xlane.xlu1 %762 }
 0xac8   :  { %vm765_vm11 = vcmp.gt.f32.partialorder %v763_v33, 0.0 }
 0xac9   :  { %v767_v35 = vsel %vm765_vm11, %v763_v33, 1.0 }
 0xaca   :  { %1317 = vrcp.f32 %v767_v35 }
 0xad0   :  { %v1316_v36 = vpop.eup %1315 }
 0xad4   :  { %v1318_v40 = vpop.eup %1317 }
 0xb0e   :  { %v807_v37 = vpop.f32.mrb[8].mxu1 }
 0xb0f   :  { %v815_v39 = vmul.f32 %v1316_v36, %v807_v37  ;;  %v1262_v0 = vpop.f32.mrb[9].mxu1 }
 0xb10   :  { %v810_v41 = vpop.f32.mrb[10].mxu1 }
 0xb11   :  { %v822_v42 = vsel %vm764_vm10, %v815_v39, 0.0  ;;  %v817_v43 = vmul.f32 %v1318_v40, %v810_v41  ;;  %v1263_v44 = vpop.f32.mrb[11].mxu1 }
 0xb12   :  { %v828_v45 = vadd.f32 %v827_v38, %v822_v42 }
 0xb13   :  { %v823_v46 = vsel %vm765_vm11, %v817_v43, 0.0 }
 0xb14   :  { %v829_v47 = vadd.f32 %v827_v38, %v823_v46  ;;  %v830_v48 = vsel %vm156_vm3, %v828_v45, 0.0 }
 0xb16   :  { %v831_v50 = vsel %vm156_vm3, %v829_v47, 0.0 }
 0xb17   :  { %v832_v51 = vadd.f32 %v831_v50, %v830_v48 }
 0xb19   :  { %v833_v54 = vrot.slane %v832_v51, 4 }
 0xb1b   :  { %v834_v55 = vadd.f32 %v833_v54, %v832_v51 }
 0xb1d   :  { %v835_v56 = vrot.slane %v834_v55, 2 }
 0xb1f   :  { %v836_v57 = vadd.f32 %v835_v56, %v834_v55 }
 0xb21   :  { %v837_v58 = vrot.slane %v836_v57, 1 }
 0xb23   :  { %v838_v59 = vadd.f32 %v837_v58, %v836_v57 }
 0xb25   :  { %v839_v60 = vmul.f32 0.0625, %v838_v59 }
 0xb27   :  { %v840_v61 = vmul.f32 %v1681_v28, %v839_v60  ;;  %v1733_v28 = vld [vmem:[%s1799_s5 + $0x18] sm:$0xff]  ;;  %s1432_s5 = smov 32  }
 0xb28   :  { %v938_v39 = vrot.slane %v1733_v28, %v1546_v13 }
 0xb29   :  { %v844_v62 = vrot.slane %v840_v61, %v1601_v52 }
 0xb2b   :  { %v845_v63 = vsub.f32 %v828_v45, %v844_v62  ;;  %v846_v1 = vsub.f32 %v829_v47, %v844_v62  ;;  %v950_v47 = vrot.slane %v1733_v28, %v1549_v16 }
 0xb2d   :  { %v847_v2 = vmul.f32 %v845_v63, %v845_v63  ;;  %v848_v3 = vmul.f32 %v846_v1, %v846_v1  ;;  %v863_v22 = vmul.f32 %v862_v21, %v845_v63  ;;  %v864_v23 = vmul.f32 %v862_v21, %v846_v1 }
 0xb2f   :  { %v849_v5 = vsel %vm156_vm3, %v847_v2, 0.0  ;;  %v850_v6 = vsel %vm156_vm3, %v848_v3, 0.0 }
 0xb30   :  { %v851_v7 = vadd.f32 %v850_v6, %v849_v5 }
 0xb32   :  { %v852_v9 = vrot.slane %v851_v7, 4 }
 0xb34   :  { %v853_v10 = vadd.f32 %v852_v9, %v851_v7 }
 0xb36   :  { %v854_v14 = vrot.slane %v853_v10, 2 }
 0xb38   :  { %v855_v15 = vadd.f32 %v854_v14, %v853_v10 }
 0xb3a   :  { %v856_v17 = vrot.slane %v855_v15, 1 }
 0xb3c   :  { %v857_v18 = vadd.f32 %v856_v17, %v855_v15 }
 0xb3e   :  { %v858_v19 = vmul.f32 0.0625, %v857_v18 }
 0xb40   :  { %v865_v20 = vadd.f32 1e-05, %v858_v19 }
 0xb42   :  { %1319 = vrsqrt.f32 %v865_v20 }
 0xb4c   :  { %v1320_v4 = vpop.eup %1319 }
 0xb4d   :  { %v867_v27 = vmul.f32 %v1320_v4, %v863_v22  ;;  %v868_v31 = vmul.f32 %v1320_v4, %v864_v23 }
 0xb4f   :  { %v873_v32 = vadd.f32 %v872_v24, %v867_v27  ;;  %v874_v33 = vadd.f32 %v872_v24, %v868_v31 }
 0xb51   :  { %v878_v34 = vmul.f32 0.01, %v874_v33  ;;  %vm875_vm0 = vcmp.gt.f32.partialorder %v873_v32, 0.0  ;;  %vm876_vm12 = vcmp.gt.f32.partialorder %v874_v33, 0.0  ;;  %v877_v35 = vmul.f32 0.01, %v873_v32 }
 0xb53   :  { %v1723_v36 = vsel %vm875_vm0, %v873_v32, %v877_v35  ;;  %v1725_v37 = vsel %vm876_vm12, %v874_v33, %v878_v34 }
 0xb54   :  { %v888_v38 = vpack.c.bf16 %v1725_v37, %v1723_v36 }
 0xb56   :  { %1269 = vmatmul.mubr.msk.bf16.vlgmr.msra.gmra.mrb[12].mxu0 %vm156_vm3, %v888_v38 }
 0xc29   :  { %v928_v0 = vpop.f32.mrb[12].mxu0 }
 0xc2a   :  { %v1270_v40 = vpop.f32.mrb[13].mxu0  ;;  %v939_v41 = vmul.f32 %v938_v39, %v928_v0  ;;  %v951_v50 = vmul.f32 %v950_v47, %v928_v0 }
 0xc2b   :  { %v931_v42 = vpop.f32.mrb[14].mxu0 }
 0xc2c   :  { %v1030_v43 = vpack.c.bf16 %v931_v42, %v928_v0  ;;  %v1271_v44 = vpop.f32.mrb[15].mxu0  ;;  %v941_v45 = vsel %vm156_vm3, %v939_v41, 0.0  ;;  %v940_v46 = vmul.f32 %v938_v39, %v931_v42  ;;  %v953_v51 = vsel %vm156_vm3, %v951_v50, 0.0 }
 0xc2d   :  { %942 = vadd.xlane.f32.xlu1 %v941_v45  ;;  %v952_v54 = vmul.f32 %v950_v47, %v931_v42 }
 0xc2e   :  { %1273 = vmatpush3.bf16.msra.mxu1 %v1030_v43  ;;  %v944_v48 = vsel %vm156_vm3, %v940_v46, 0.0 }
 0xc2f   :  { %v956_v55 = vsel %vm156_vm3, %v952_v54, 0.0 }
 0xc31   :  { %945 = vadd.xlane.f32.xlu1 %v944_v48 }
 0xc35   :  { %954 = vadd.xlane.f32.xlu1 %v953_v51 }
 0xc39   :  { %957 = vadd.xlane.f32.xlu1 %v956_v55 }
 0xcba   :  { %v943_v56 = vpop.xlane.xlu1 %942 }
 0xcbb   :  { %959 = vxpose.xlu1.b32.start [1/2] (short) (narrow) %v943_v56, 8 }
 0xcbe   :  { %v946_v57 = vpop.xlane.xlu1 %945 }
 0xcbf   :  { %960 = vxpose.xlu1.b32.end [2/2] (short) (narrow) %v946_v57, 8 }
 0xcc2   :  { %v955_v58 = vpop.xlane.xlu1 %954 }
 0xcc6   :  { %v958_v59 = vpop.xlane.xlu1 %957 }
 0xd3b   :  { %v975_v16 = vpop.trf.xlu1 }
 0xd3c   :  { %v994_v60 = vrot.slane %v975_v16, %v1546_v13 }
 0xd3e   :  { %v995_v61 = vadd.f32 %v994_v60, %v955_v58  ;;  %v996_v62 = vadd.f32 %v994_v60, %v958_v59 }
 0xd40   :  { %vm997_vm13 = vcmp.gt.f32.partialorder %v995_v61, 0.0  ;;  %v999_v63 = vmul.f32 0.2, %v995_v61  ;;  %vm998_vm14 = vcmp.gt.f32.partialorder %v996_v62, 0.0  ;;  %v1000_v1 = vmul.f32 0.2, %v996_v62 }
 0xd42   :  { %v1001_v2 = vsel %vm997_vm13, %v995_v61, %v999_v63  ;;  %v1002_v3 = vsel %vm998_vm14, %v996_v62, %v1000_v1 }
 0xd43   :  { %v1003_v5 = vsel %vm66_vm4, %v1001_v2, -1e+30  ;;  %v1004_v7 = vsel %vm67_vm8, %v1002_v3, -1e+30 }
 0xd44   :  { %v1005_v6 = vsel %vm221_vm7, %v1003_v5, -inf  ;;  %v1008_v9 = vsel %vm221_vm7, %v1004_v7, -inf }
 0xd45   :  { %1006 = vmax.xlane.f32.xlu0 %v1005_v6 }
 0xd49   :  { %1009 = vmax.xlane.f32.xlu0 %v1008_v9 }
 0xdd2   :  { %v1007_v13 = vpop.xlane.xlu0 %1006 }
 0xdd3   :  { %v1011_v10 = vsub.f32 %v1003_v5, %v1007_v13  ;;  %v1133_v13 = vrot.slane %v1733_v28, %v1610_v11 }
 0xdd5   :  { %v1013_v14 = vmul.f32 1.442695, %v1011_v10 }
 0xdd6   :  { %v1010_v15 = vpop.xlane.xlu0 %1009 }
 0xdd7   :  { %1321 = vpow2.f32 %v1013_v14  ;;  %v1012_v17 = vsub.f32 %v1004_v7, %v1010_v15 }
 0xdd9   :  { %v1015_v18 = vmul.f32 1.442695, %v1012_v17 }
 0xddb   :  { %1323 = vpow2.f32 %v1015_v18 }
 0xde1   :  { %v1322_v19 = vpop.eup %1321 }
 0xde2   :  { %v1017_v20 = vsel %vm66_vm4, %v1322_v19, 0.0 }
 0xde3   :  { %v1019_v21 = vsel %vm221_vm7, %v1017_v20, 0.0 }
 0xde4   :  { %1020 = vadd.xlane.f32.xlu1 %v1019_v21 }
 0xde5   :  { %v1324_v22 = vpop.eup %1323 }
 0xde6   :  { %v1018_v23 = vsel %vm67_vm8, %v1324_v22, 0.0 }
 0xde7   :  { %v1022_v24 = vsel %vm221_vm7, %v1018_v23, 0.0  ;;  %v1029_v4 = vpack.c.bf16 %v1018_v23, %v1017_v20 }
 0xde8   :  { %1023 = vadd.xlane.f32.xlu0 %v1022_v24 }
 0xde9   :  { %1275 = vmatmul.mubr.msk.bf16.vlgmr.msra.gmra.mrb[12].mxu1 %vm221_vm7, %v1029_v4 }
 0xdfe   :  { %1144 = vrot.lane.b32.xlu0 %v1669_v29, %s1432_s5  ;;  %v1088_v29 = vrot.slane %v1733_v28, %v1532_v8 }
 0xe02   :  { %1146 = vrot.lane.b32.xlu0 %v1671_v30, %s1432_s5 }
 0xe06   :  { %1152 = vrot.lane.b32.xlu0 %v1723_v36, %s1433_s21 }
 0xe0a   :  { %1154 = vrot.lane.b32.xlu0 %v1725_v37, %s1433_s21 }
 0xe71   :  { %v1021_v49 = vpop.xlane.xlu1 %1020 }
 0xe72   :  { %vm1025_vm4 = vcmp.gt.f32.partialorder %v1021_v49, 0.0 }
 0xe73   :  { %v1027_v53 = vsel %vm1025_vm4, %v1021_v49, 1.0 }
 0xe74   :  { %1325 = vrcp.f32 %v1027_v53 }
 0xe75   :  { %v1024_v27 = vpop.xlane.xlu0 %1023 }
 0xe76   :  { %vm1026_vm8 = vcmp.gt.f32.partialorder %v1024_v27, 0.0 }
 0xe77   :  { %v1028_v31 = vsel %vm1026_vm8, %v1024_v27, 1.0 }
 0xe78   :  { %1327 = vrcp.f32 %v1028_v31 }
 0xe7e   :  { %v1326_v32 = vpop.eup %1325 }
 0xe82   :  { %v1328_v35 = vpop.eup %1327 }
 0xebc   :  { %v1068_v33 = vpop.f32.mrb[12].mxu1 }
 0xebd   :  { %v1076_v30 = vmul.f32 %v1326_v32, %v1068_v33  ;;  %v1276_v34 = vpop.f32.mrb[13].mxu1 }
 0xebe   :  { %v1071_v36 = vpop.f32.mrb[14].mxu1 }
 0xebf   :  { %v1083_v38 = vsel %vm1025_vm4, %v1076_v30, 0.0  ;;  %v1078_v37 = vmul.f32 %v1328_v35, %v1071_v36  ;;  %v1277_v39 = vpop.f32.mrb[15].mxu1 }
 0xec0   :  { %v1089_v0 = vadd.f32 %v1088_v29, %v1083_v38 }
 0xec1   :  { %v1084_v40 = vsel %vm1026_vm8, %v1078_v37, 0.0 }
 0xec2   :  { %v1090_v41 = vadd.f32 %v1088_v29, %v1084_v40  ;;  %v1091_v42 = vsel %vm156_vm3, %v1089_v0, 0.0 }
 0xec4   :  { %v1092_v43 = vsel %vm156_vm3, %v1090_v41, 0.0 }
 0xec5   :  { %v1093_v44 = vadd.f32 %v1092_v43, %v1091_v42 }
 0xec7   :  { %v1094_v45 = vrot.slane %v1093_v44, 4 }
 0xec9   :  { %v1095_v46 = vadd.f32 %v1094_v45, %v1093_v44 }
 0xecb   :  { %v1096_v47 = vrot.slane %v1095_v46, 2 }
 0xecd   :  { %v1097_v8 = vadd.f32 %v1096_v47, %v1095_v46 }
 0xecf   :  { %v1098_v48 = vrot.slane %v1097_v8, 1 }
 0xed1   :  { %v1099_v50 = vadd.f32 %v1098_v48, %v1097_v8 }
 0xed3   :  { %v1100_v51 = vmul.f32 0.0625, %v1099_v50 }
 0xed5   :  { %v1101_v54 = vmul.f32 %v1733_v28, %v1100_v51 }
 0xed7   :  { %v1105_v55 = vrot.slane %v1101_v54, %v1601_v52  ;;  %v1123_v52 = vrot.slane %v1733_v28, %v1543_v12  ;;  %v1145_v12 = vpop.permute.xlu0 %1144 }
 0xed8   :  { %v1166_v11 = vsel %vm156_vm3, %v1614_v25, %v1145_v12 }
 0xed9   :  { %v1106_v56 = vsub.f32 %v1089_v0, %v1105_v55  ;;  %v1107_v57 = vsub.f32 %v1090_v41, %v1105_v55 }
 0xedb   :  { %v1108_v58 = vmul.f32 %v1106_v56, %v1106_v56  ;;  %v1109_v59 = vmul.f32 %v1107_v57, %v1107_v57  ;;  %v1125_v9 = vmul.f32 %v1123_v52, %v1107_v57  ;;  %v1124_v10 = vmul.f32 %v1123_v52, %v1106_v56  ;;  %v1147_v24 = vpop.permute.xlu0 %1146 }
 0xedc   :  { %v1167_v28 = vsel %vm156_vm3, %v1616_v26, %v1147_v24 }
 0xedd   :  { %v1110_v16 = vsel %vm156_vm3, %v1108_v58, 0.0  ;;  %v1111_v60 = vsel %vm156_vm3, %v1109_v59, 0.0 }
 0xede   :  { %v1112_v61 = vadd.f32 %v1111_v60, %v1110_v16 }
 0xedf   :  { %v1153_v4 = vpop.permute.xlu0 %1152 }
 0xee0   :  { %v1113_v62 = vrot.slane %v1112_v61, 4  ;;  %v1169_v27 = vsel %vm1168_vm1, %v1166_v11, %v1153_v4 }
 0xee2   :  { %v1114_v63 = vadd.f32 %v1113_v62, %v1112_v61 }
 0xee3   :  { %v1155_v49 = vpop.permute.xlu0 %1154 }
 0xee4   :  { %v1115_v1 = vrot.slane %v1114_v63, 2  ;;  %v1170_v53 = vsel %vm1168_vm1, %v1167_v28, %v1155_v49 }
 0xee6   :  { %v1116_v2 = vadd.f32 %v1115_v1, %v1114_v63 }
 0xee8   :  { %v1117_v3 = vrot.slane %v1116_v2, 1 }
 0xeea   :  { %v1118_v5 = vadd.f32 %v1117_v3, %v1116_v2 }
 0xeec   :  { %v1119_v6 = vmul.f32 0.0625, %v1118_v5 }
 0xeee   :  { %v1126_v7 = vadd.f32 1e-05, %v1119_v6 }
 0xef0   :  { %1329 = vrsqrt.f32 %v1126_v7 }
 0xefa   :  { %v1330_v14 = vpop.eup %1329 }
 0xefb   :  { %v1129_v15 = vmul.f32 %v1330_v14, %v1125_v9  ;;  %v1128_v17 = vmul.f32 %v1330_v14, %v1124_v10 }
 0xefd   :  { %v1135_v18 = vadd.f32 %v1133_v13, %v1129_v15  ;;  %v1134_v19 = vadd.f32 %v1133_v13, %v1128_v17 }
 0xeff   :  { %vm1137_vm7 = vcmp.gt.f32.partialorder %v1135_v18, 0.0  ;;  %v1139_v20 = vmul.f32 0.01, %v1135_v18  ;;  %vm1136_vm15 = vcmp.gt.f32.partialorder %v1134_v19, 0.0  ;;  %v1138_v21 = vmul.f32 0.01, %v1134_v19 }
 0xf01   :  { %v1141_v22 = vsel %vm1137_vm7, %v1135_v18, %v1139_v20  ;;  %v1140_v23 = vsel %vm1136_vm15, %v1134_v19, %v1138_v21 }
 0xf02   :  { %1162 = vrot.lane.b32.xlu0 %v1141_v22, %s1434_s22  ;;  %1160 = vrot.lane.b32.xlu1 %v1140_v23, %s1434_s22 }
 0xf74   :  { %v1161_v31 = vpop.permute.xlu1 %1160  ;;  %v1163_v32 = vpop.permute.xlu0 %1162 }
 0xf75   :  { %v1172_v33 = vsel %vm1171_vm2, %v1169_v27, %v1161_v31  ;;  %v1173_v29 = vsel %vm1171_vm2, %v1170_v53, %v1163_v32 }
 0xf76   :  { %1174 = vst [vmem:[#allocation8] sm:$0xff] %v1172_v33  ;;  %1175 = vst [vmem:[#allocation8 + $0x8] sm:$0xff] %v1173_v29 }
 0xf77   :  { %1408 = shalt.err (!%p1405_p0)
}
 0xf78   :  { %s1409_s29 = scalar_lea.hbm %s1800_s6, 256 }
 0xf79   :  { %p1410_p1 = scmp.ne.s32.totalorder %s1800_s6, %s1409_s29  ;;  %p1413_p2 = scmp.lt.u32.totalorder %s1409_s29, %s1800_s6 }
 0xf7b   :  { %p1415_p3 = pnand %p1413_p2, %p1410_p1 }
 0xf7d   :  { %1418 = shalt.err (!%p1415_p3)
}
 0xf7e   :  { %1187 = dma.vmem_to_hbm [thread:$0]  %s1182_s25, 256, %s1800_s6, [#allocation4], %s1427_s2, %s1427_s2, %s1428_s19  }
 0xf7f   :  { %1423 = dma.done.wait [#allocation4], 256  }
 0xf80   :  { %1424 = vsyncadd [#allocation4], 4294967040 }
 0xf81   :  { %1191 = vsyncpa [#allocation3], 1 }
 0xf82   :  { %1192 = vsyncpa [#allocation6], 1 }
 0xf83   :  { %1193 = vsyncpa [#allocation4], 1 }

</bundles_post_ra>
